<compile_context>
chip_gen: v7x
topology: tpu7x:2x2x1
jax: 0.10.0
libtpu: 0.0.40
codegen_flags: <defaults>
</compile_context>

<pallas_src>
import jax
import jax.numpy as jnp
from jax.experimental import pallas as pl
from jax.experimental.pallas import tpu as pltpu

PAD = 0

# ---------------- config (small synthetic sizes) ----------------
USER_SIZE = 50
HIDDEN = 32
N_HEADS = 4
N_INTERVAL = 3
BATCH = 2
CAS_LEN = 9           # -> seed/gold length L = 8
NEG_INF = -1e9
U_PAD = 128           # lane-dense padded user dim for the final store


# ======================= fused SDVD head kernel =======================
def _sdvd_fused_kernel(
        dyn_cas_ref, dyn_user_ref, static_ref, kbias_ref, pmask_ref,
        f1_w1_ref, f1_b1_ref, f1_w2_ref, f1_b2_ref,
        a1_wq_ref, a1_bq_ref, a1_wkv_ref, a1_bkv_ref, a1_wo_ref, a1_bo_ref,
        a2_wq_ref, a2_bq_ref, a2_wkv_ref, a2_bkv_ref, a2_wo_ref, a2_bo_ref,
        f2_w1_ref, f2_b1_ref, f2_w2_ref, f2_b2_ref,
        lw_ref, lb_ref,
        out_ref):
    B, L, H = dyn_cas_ref.shape
    N = B * L
    hd = H // N_HEADS
    scale = 1.0 / (hd ** 0.5)
    u_pad = pmask_ref.shape[-1]

    dyn_cas = dyn_cas_ref[...].reshape(N, H)
    dyn_user = dyn_user_ref[...].reshape(N, H)
    static2d = static_ref[...].reshape(N, H)
    kbias = kbias_ref[...][:, None, :]                     # (B,1,L) key-pad bias

    def gated_fusion(x1, x2, w1, b1, w2, b2):
        # torch GatedFusion: same transform on both stacked branches, softmax
        # over the branch axis, weighted sum.  Stack -> one matmul per weight.
        x12 = jnp.concatenate([x1, x2], axis=0)                           # (2N,H)
        h = jnp.tanh(jnp.dot(x12, w1, preferred_element_type=jnp.float32) + b1)
        s = jnp.dot(h, w2, preferred_element_type=jnp.float32) + b2       # (2N,1)
        s1, s2 = s[:N], s[N:]
        m = jnp.maximum(s1, s2)
        e1 = jnp.exp(s1 - m)
        e2 = jnp.exp(s2 - m)
        inv = pl.reciprocal(e1 + e2, approx=True)
        return (e1 * x1 + e2 * x2) * inv

    def mha(q2d, kv2d, wq, bq, wkv, bkv, wo, bo):
        # TODO(synk): Transformer internals (residual/LN/FFN) are not in the
        # reference snippet; standard MHA with key-padding mask, eval dropout.
        # NOTE: a fully-padded key row would still produce NaN (parity with the
        # torch reference); not triggered by the given lengths.
        qp = jnp.dot(q2d, wq, preferred_element_type=jnp.float32) + bq        # (N,H)
        kvp = jnp.dot(kv2d, wkv, preferred_element_type=jnp.float32) + bkv    # (N,2H)
        qp3 = qp.reshape(B, L, H)
        kp3 = kvp[:, :H].reshape(B, L, H)
        vp3 = kvp[:, H:].reshape(B, L, H)
        o_heads = []
        for h in range(N_HEADS):                     # static unroll (4 heads)
            lo = h * hd
            qh = qp3[:, :, lo:lo + hd]
            kh = kp3[:, :, lo:lo + hd]
            vh = vp3[:, :, lo:lo + hd]
            s = jnp.einsum('bqd,bkd->bqk', qh, kh,
                           preferred_element_type=jnp.float32) * scale + kbias
            s = s - jnp.max(s, axis=-1, keepdims=True)
            p = jnp.exp(s)
            p = p * pl.reciprocal(jnp.sum(p, axis=-1, keepdims=True), approx=True)
            o_heads.append(jnp.einsum('bqk,bkd->bqd', p, vh,
                                      preferred_element_type=jnp.float32))
        o = jnp.concatenate(o_heads, axis=-1).reshape(N, H)
        # single output projection after the head loop
        return jnp.dot(o, wo, preferred_element_type=jnp.float32) + bo        # (N,H)

    fe = gated_fusion(dyn_cas, dyn_user,
                      f1_w1_ref[...], f1_b1_ref[...], f1_w2_ref[...], f1_b2_ref[0, 0])
    fe1 = mha(static2d, fe,
              a1_wq_ref[...], a1_bq_ref[...], a1_wkv_ref[...], a1_bkv_ref[...],
              a1_wo_ref[...], a1_bo_ref[...])
    fe2 = mha(fe, static2d,
              a2_wq_ref[...], a2_bq_ref[...], a2_wkv_ref[...], a2_bkv_ref[...],
              a2_wo_ref[...], a2_bo_ref[...])
    fe = gated_fusion(fe1, fe2,
                      f2_w1_ref[...], f2_b1_ref[...], f2_w2_ref[...], f2_b2_ref[0, 0])

    logits = (jnp.dot(fe, lw_ref[...], preferred_element_type=jnp.float32)
              + lb_ref[...] + pmask_ref[...].reshape(N, u_pad))               # (N,U_PAD)
    out_ref[...] = logits.reshape(out_ref.shape).astype(out_ref.dtype)


def sdvd_head_fused(params, dyn_cas, dyn_user, static_emb, key_bias, prev_mask):
    B, L, H = dyn_cas.shape
    f1_w1, f1_b1, f1_w2, f1_b2 = params['fusion1']
    f2_w1, f2_b1, f2_w2, f2_b2 = params['fusion2']

    def pack_attn(p):
        wq, bq, wk, bk, wv, bv, wo, bo = p
        wkv = jnp.concatenate([wk, wv], axis=1)           # (H, 2H)
        bkv = jnp.concatenate([bk, bv], axis=1)           # (1, 2H)
        return (wq, bq, wkv, bkv, wo, bo)

    a1 = pack_attn(params['attn1'])
    a2 = pack_attn(params['attn2'])

    lw, lb = params['linear1']
    U = lw.shape[1]
    lw_pad = jnp.pad(lw, ((0, 0), (0, U_PAD - U)))
    lb_pad = jnp.pad(lb, ((0, 0), (0, U_PAD - U)))
    pm_pad = jnp.pad(prev_mask, ((0, 0), (0, 0), (0, U_PAD - U)))

    vmem = pl.BlockSpec(memory_space=pltpu.MemorySpace.VMEM)
    smem = pl.BlockSpec(memory_space=pltpu.MemorySpace.SMEM)
    in_specs = ([vmem] * 5                         # activations + masks
                + [vmem, vmem, vmem, smem]         # fusion1 (b2 scalar -> SMEM)
                + [vmem] * 6                       # attn1
                + [vmem] * 6                       # attn2
                + [vmem, vmem, vmem, smem]         # fusion2
                + [vmem, vmem])                    # linear1 (padded)

    out = pl.pallas_call(
        _sdvd_fused_kernel,
        out_shape=jax.ShapeDtypeStruct((B, L, U_PAD), jnp.float32),
        in_specs=in_specs,
        out_specs=vmem,
    )(dyn_cas, dyn_user, static_emb, key_bias, pm_pad,
      f1_w1, f1_b1, f1_w2, f1_b2,
      *a1, *a2,
      f2_w1, f2_b1, f2_w2, f2_b2,
      lw_pad, lb_pad)
    return out[:, :, :U]                                   # (B, L, user_size)


# ======================= plain-JAX glue =======================
def get_previous_user_mask(seq, user_size):
    # hit[b, l, u] = (u == PAD) or (exists p <= l with seq[b, p] == u)
    # (equivalent to the torch tril + one_hot formulation, without the
    #  (B, L, L+1, user_size) intermediate)
    oh = jax.nn.one_hot(seq, user_size, dtype=jnp.float32)         # (B, L, U)
    seen = jnp.cumsum(oh, axis=1) > 0
    seen = seen | (jnp.arange(user_size)[None, None, :] == PAD)
    return jnp.where(seen, -1000.0, 0.0).astype(jnp.float32)       # (B, L, U)


def init_params(key):
    keys = jax.random.split(key, 8)

    def lin(k, fan_in, fan_out):
        kw, kb = jax.random.split(k)
        w = jax.random.normal(kw, (fan_in, fan_out), jnp.float32) * 0.05
        b = jax.random.normal(kb, (1, fan_out), jnp.float32) * 0.01
        return w, b

    emb = jax.random.normal(keys[0], (USER_SIZE, HIDDEN), jnp.float32) * 0.1
    emb = emb.at[PAD].set(0.0)  # nn.Embedding(padding_idx=PAD)

    def fusion_params(k):
        k1, k2 = jax.random.split(k)
        w1, b1 = lin(k1, HIDDEN, HIDDEN)
        w2, b2 = lin(k2, HIDDEN, 1)
        return (w1, b1, w2, b2)

    def attn_params(k):
        ks = jax.random.split(k, 4)
        return (*lin(ks[0], HIDDEN, HIDDEN), *lin(ks[1], HIDDEN, HIDDEN),
                *lin(ks[2], HIDDEN, HIDDEN), *lin(ks[3], HIDDEN, HIDDEN))

    return {
        'user_embedding': emb,
        'fusion1': fusion_params(keys[1]),
        'fusion2': fusion_params(keys[2]),
        'attn1': attn_params(keys[3]),
        'attn2': attn_params(keys[4]),
        'linear1': lin(keys[5], HIDDEN, USER_SIZE),
        'dyn_user_scale': 1.0 + 0.1 * jnp.arange(1, N_INTERVAL + 1, dtype=jnp.float32),
        'dyn_cas_scale': 1.0 - 0.05 * jnp.arange(1, N_INTERVAL + 1, dtype=jnp.float32),
    }


def sdvd_forward(params, cas, timestamp, cas_index, interval_times):
    """Eval-mode SDVD forward (dropout = identity, CE-loss path skipped)."""
    seed_seq = cas[:, :-1]
    seed_timestamp = timestamp[:, :-1]
    B, L = seed_seq.shape
    mask_pad = seed_seq == PAD
    cas_idx = jnp.broadcast_to(cas_index[:, None], (B, L))

    # TODO(synk): StaticGraphEnocoder (GCN over static graphs) not provided;
    # the user-embedding table stands in for its output node-embedding matrix.
    static_emb_mat = params['user_embedding']
    static_emb = static_emb_mat[seed_seq]          # F.embedding(seed_seq, static_emb_mat)
    init_emb_mat = static_emb_mat

    # TODO(synk): DynamicVHGAE not provided; substitute deterministic per-interval
    # user/cascade embedding matrices derived from init_emb_mat.
    emb_list = {int(t): (init_emb_mat * params['dyn_user_scale'][i],
                         init_emb_mat * params['dyn_cas_scale'][i])
                for i, t in enumerate(interval_times)}

    zero_vec = jnp.zeros_like(seed_seq)
    dyn_user = jnp.zeros((B, L, HIDDEN), jnp.float32)
    dyn_cas = jnp.zeros((B, L, HIDDEN), jnp.float32)
    pre_time = 0
    for i, t in enumerate(sorted(emb_list.keys())):
        sub_user_index = (jnp.where(seed_timestamp <= t, seed_seq, zero_vec)
                          - jnp.where(seed_timestamp <= pre_time, seed_seq, zero_vec))
        sub_cas_index = jnp.where(sub_user_index != PAD, cas_idx, zero_vec)
        sub_mask = (sub_user_index == PAD)[..., None]
        if i == 0:
            user_mat, cas_mat = init_emb_mat, init_emb_mat
        else:
            user_mat, cas_mat = emb_list[pre_time]
        sub_user_emb = jnp.where(sub_mask, 0.0, user_mat[sub_user_index])
        sub_cas_emb = jnp.where(sub_mask, 0.0, cas_mat[sub_cas_index])
        dyn_user = dyn_user + sub_user_emb
        dyn_cas = dyn_cas + sub_cas_emb
        pre_time = t

    key_bias = jnp.where(mask_pad, NEG_INF, 0.0).astype(jnp.float32)   # (B, L)
    prev_mask = get_previous_user_mask(seed_seq, USER_SIZE)            # (B, L, U)

    # fusion1 -> attn1 -> attn2 -> fusion2 -> linear(+mask), all in one kernel
    return sdvd_head_fused(params, dyn_cas, dyn_user, static_emb, key_bias, prev_mask)


if __name__ == "__main__":
    key = jax.random.PRNGKey(0)
    kp, kc, ki = jax.random.split(key, 3)
    params = init_params(kp)

    # deterministic synthetic cascades (user ids), PAD-padded tails
    cas = jax.random.randint(kc, (BATCH, CAS_LEN), 1, USER_SIZE, dtype=jnp.int32)
    lengths = jnp.array([7, 5], dtype=jnp.int32)
    pos = jnp.arange(CAS_LEN)[None, :]
    cas = jnp.where(pos < lengths[:, None], cas, PAD)
    timestamp = jnp.where(pos < lengths[:, None],
                          (pos + 1) * jnp.array([[1], [2]], jnp.int32), 0).astype(jnp.int32)
    cas_index = jax.random.randint(ki, (BATCH,), 1, USER_SIZE, dtype=jnp.int32)
    interval_times = [3, 6, 9]                       # n_interval = 3 time boundaries

    pred = sdvd_forward(params, cas, timestamp, cas_index, interval_times)
    pred = jax.block_until_ready(pred)
    assert pred.shape == (BATCH, CAS_LEN - 1, USER_SIZE)
    assert bool(jnp.all(jnp.isfinite(pred)))
    print("KERNEL_OK")
</pallas_src>

<mosaic_0001>
module attributes {stable_mosaic.version = 11 : i64} {
  func.func @_sdvd_fused_kernel(%arg0: memref<2x8x32xf32, #tpu.memory_space<vmem>>, %arg1: memref<2x8x32xf32, #tpu.memory_space<vmem>>, %arg2: memref<2x8x32xf32, #tpu.memory_space<vmem>>, %arg3: memref<2x8xf32, #tpu.memory_space<vmem>>, %arg4: memref<2x8x128xf32, #tpu.memory_space<vmem>>, %arg5: memref<32x32xf32, #tpu.memory_space<vmem>>, %arg6: memref<1x32xf32, #tpu.memory_space<vmem>>, %arg7: memref<32x1xf32, #tpu.memory_space<vmem>>, %arg8: memref<1x1xf32, #tpu.memory_space<smem>>, %arg9: memref<32x32xf32, #tpu.memory_space<vmem>>, %arg10: memref<1x32xf32, #tpu.memory_space<vmem>>, %arg11: memref<32x64xf32, #tpu.memory_space<vmem>>, %arg12: memref<1x64xf32, #tpu.memory_space<vmem>>, %arg13: memref<32x32xf32, #tpu.memory_space<vmem>>, %arg14: memref<1x32xf32, #tpu.memory_space<vmem>>, %arg15: memref<32x32xf32, #tpu.memory_space<vmem>>, %arg16: memref<1x32xf32, #tpu.memory_space<vmem>>, %arg17: memref<32x64xf32, #tpu.memory_space<vmem>>, %arg18: memref<1x64xf32, #tpu.memory_space<vmem>>, %arg19: memref<32x32xf32, #tpu.memory_space<vmem>>, %arg20: memref<1x32xf32, #tpu.memory_space<vmem>>, %arg21: memref<32x32xf32, #tpu.memory_space<vmem>>, %arg22: memref<1x32xf32, #tpu.memory_space<vmem>>, %arg23: memref<32x1xf32, #tpu.memory_space<vmem>>, %arg24: memref<1x1xf32, #tpu.memory_space<smem>>, %arg25: memref<32x128xf32, #tpu.memory_space<vmem>>, %arg26: memref<1x128xf32, #tpu.memory_space<vmem>>, %arg27: memref<2x8x128xf32, #tpu.memory_space<vmem>>) attributes {dimension_semantics = [], scalar_prefetch = 0 : i64, scratch_operands = 0 : i64, tpu.core_type = #tpu.core_type<tc>} {
    %c0 = arith.constant 0 : index
    %c0_0 = arith.constant 0 : index
    %c0_1 = arith.constant 0 : index
    %0 = vector.load %arg0[%c0, %c0_0, %c0_1] : memref<2x8x32xf32, #tpu.memory_space<vmem>>, vector<2x8x32xf32>
    %1 = vector.shape_cast %0 : vector<2x8x32xf32> to vector<16x32xf32>
    %c0_2 = arith.constant 0 : index
    %c0_3 = arith.constant 0 : index
    %c0_4 = arith.constant 0 : index
    %2 = vector.load %arg1[%c0_2, %c0_3, %c0_4] : memref<2x8x32xf32, #tpu.memory_space<vmem>>, vector<2x8x32xf32>
    %3 = vector.shape_cast %2 : vector<2x8x32xf32> to vector<16x32xf32>
    %c0_5 = arith.constant 0 : index
    %c0_6 = arith.constant 0 : index
    %c0_7 = arith.constant 0 : index
    %4 = vector.load %arg2[%c0_5, %c0_6, %c0_7] : memref<2x8x32xf32, #tpu.memory_space<vmem>>, vector<2x8x32xf32>
    %5 = vector.shape_cast %4 : vector<2x8x32xf32> to vector<16x32xf32>
    %c0_8 = arith.constant 0 : index
    %c0_9 = arith.constant 0 : index
    %6 = vector.load %arg3[%c0_8, %c0_9] : memref<2x8xf32, #tpu.memory_space<vmem>>, vector<2x8xf32>
    %7 = vector.shape_cast %6 : vector<2x8xf32> to vector<2x1x8xf32>
    %c0_10 = arith.constant 0 : index
    %c0_11 = arith.constant 0 : index
    %8 = vector.load %arg5[%c0_10, %c0_11] : memref<32x32xf32, #tpu.memory_space<vmem>>, vector<32x32xf32>
    %c0_12 = arith.constant 0 : index
    %c0_13 = arith.constant 0 : index
    %9 = vector.load %arg6[%c0_12, %c0_13] : memref<1x32xf32, #tpu.memory_space<vmem>>, vector<1x32xf32>
    %c0_14 = arith.constant 0 : index
    %c0_15 = arith.constant 0 : index
    %10 = vector.load %arg7[%c0_14, %c0_15] : memref<32x1xf32, #tpu.memory_space<vmem>>, vector<32x1xf32>
    %c0_16 = arith.constant 0 : index
    %c0_17 = arith.constant 0 : index
    %11 = memref.load %arg8[%c0_16, %c0_17] : memref<1x1xf32, #tpu.memory_space<smem>>
    %12 = tpu.concatenate %1, %3 in 0 : vector<16x32xf32>, vector<16x32xf32> -> vector<32x32xf32>
    %cst = arith.constant dense<0.000000e+00> : vector<32x32xf32>
    %13 = tpu.matmul %12, %8, %cst {dimension_numbers = #tpu.dot_dimension_numbers<[1], [0], [0], [1], [0, 0, 1, 1], [], []>} : vector<32x32xf32>, vector<32x32xf32>, vector<32x32xf32> -> vector<32x32xf32>
    %14 = vector.broadcast %9 : vector<1x32xf32> to vector<32x32xf32>
    %15 = arith.addf %13, %14 : vector<32x32xf32>
    %16 = math.tanh %15 : vector<32x32xf32>
    %cst_18 = arith.constant dense<0.000000e+00> : vector<32x1xf32>
    %17 = tpu.matmul %16, %10, %cst_18 {dimension_numbers = #tpu.dot_dimension_numbers<[1], [0], [0], [1], [0, 0, 1, 1], [], []>} : vector<32x32xf32>, vector<32x1xf32>, vector<32x1xf32> -> vector<32x1xf32>
    %18 = vector.broadcast %11 : f32 to vector<32x1xf32>
    %19 = arith.addf %17, %18 : vector<32x1xf32>
    %20 = vector.extract_strided_slice %19 {offsets = [0, 0], sizes = [16, 1], strides = [1, 1]} : vector<32x1xf32> to vector<16x1xf32>
    %21 = vector.extract_strided_slice %19 {offsets = [16, 0], sizes = [16, 1], strides = [1, 1]} : vector<32x1xf32> to vector<16x1xf32>
    %22 = arith.maximumf %20, %21 : vector<16x1xf32>
    %23 = arith.subf %20, %22 : vector<16x1xf32>
    %24 = math.exp %23 : vector<16x1xf32>
    %25 = arith.subf %21, %22 : vector<16x1xf32>
    %26 = math.exp %25 : vector<16x1xf32>
    %27 = arith.addf %24, %26 : vector<16x1xf32>
    %28 = tpu.reciprocal %27 {approx = true} : vector<16x1xf32> -> vector<16x1xf32>
    %29 = vector.broadcast %24 : vector<16x1xf32> to vector<16x32xf32>
    %30 = arith.mulf %29, %1 : vector<16x32xf32>
    %31 = vector.broadcast %26 : vector<16x1xf32> to vector<16x32xf32>
    %32 = arith.mulf %31, %3 : vector<16x32xf32>
    %33 = arith.addf %30, %32 : vector<16x32xf32>
    %34 = vector.broadcast %28 : vector<16x1xf32> to vector<16x32xf32>
    %35 = arith.mulf %33, %34 : vector<16x32xf32>
    %c0_19 = arith.constant 0 : index
    %c0_20 = arith.constant 0 : index
    %36 = vector.load %arg9[%c0_19, %c0_20] : memref<32x32xf32, #tpu.memory_space<vmem>>, vector<32x32xf32>
    %c0_21 = arith.constant 0 : index
    %c0_22 = arith.constant 0 : index
    %37 = vector.load %arg10[%c0_21, %c0_22] : memref<1x32xf32, #tpu.memory_space<vmem>>, vector<1x32xf32>
    %c0_23 = arith.constant 0 : index
    %c0_24 = arith.constant 0 : index
    %38 = vector.load %arg11[%c0_23, %c0_24] : memref<32x64xf32, #tpu.memory_space<vmem>>, vector<32x64xf32>
    %c0_25 = arith.constant 0 : index
    %c0_26 = arith.constant 0 : index
    %39 = vector.load %arg12[%c0_25, %c0_26] : memref<1x64xf32, #tpu.memory_space<vmem>>, vector<1x64xf32>
    %c0_27 = arith.constant 0 : index
    %c0_28 = arith.constant 0 : index
    %40 = vector.load %arg13[%c0_27, %c0_28] : memref<32x32xf32, #tpu.memory_space<vmem>>, vector<32x32xf32>
    %c0_29 = arith.constant 0 : index
    %c0_30 = arith.constant 0 : index
    %41 = vector.load %arg14[%c0_29, %c0_30] : memref<1x32xf32, #tpu.memory_space<vmem>>, vector<1x32xf32>
    %cst_31 = arith.constant dense<0.000000e+00> : vector<16x32xf32>
    %42 = tpu.matmul %5, %36, %cst_31 {dimension_numbers = #tpu.dot_dimension_numbers<[1], [0], [0], [1], [0, 0, 1, 1], [], []>} : vector<16x32xf32>, vector<32x32xf32>, vector<16x32xf32> -> vector<16x32xf32>
    %43 = vector.broadcast %37 : vector<1x32xf32> to vector<16x32xf32>
    %44 = arith.addf %42, %43 : vector<16x32xf32>
    %cst_32 = arith.constant dense<0.000000e+00> : vector<16x64xf32>
    %45 = tpu.matmul %35, %38, %cst_32 {dimension_numbers = #tpu.dot_dimension_numbers<[1], [0], [0], [1], [0, 0, 1, 1], [], []>} : vector<16x32xf32>, vector<32x64xf32>, vector<16x64xf32> -> vector<16x64xf32>
    %46 = vector.broadcast %39 : vector<1x64xf32> to vector<16x64xf32>
    %47 = arith.addf %45, %46 : vector<16x64xf32>
    %48 = vector.shape_cast %44 : vector<16x32xf32> to vector<2x8x32xf32>
    %49 = vector.extract_strided_slice %47 {offsets = [0, 0], sizes = [16, 32], strides = [1, 1]} : vector<16x64xf32> to vector<16x32xf32>
    %50 = vector.shape_cast %49 : vector<16x32xf32> to vector<2x8x32xf32>
    %51 = vector.extract_strided_slice %47 {offsets = [0, 32], sizes = [16, 32], strides = [1, 1]} : vector<16x64xf32> to vector<16x32xf32>
    %52 = vector.shape_cast %51 : vector<16x32xf32> to vector<2x8x32xf32>
    %53 = vector.extract_strided_slice %48 {offsets = [0, 0, 0], sizes = [2, 8, 8], strides = [1, 1, 1]} : vector<2x8x32xf32> to vector<2x8x8xf32>
    %54 = vector.extract_strided_slice %50 {offsets = [0, 0, 0], sizes = [2, 8, 8], strides = [1, 1, 1]} : vector<2x8x32xf32> to vector<2x8x8xf32>
    %55 = vector.extract_strided_slice %52 {offsets = [0, 0, 0], sizes = [2, 8, 8], strides = [1, 1, 1]} : vector<2x8x32xf32> to vector<2x8x8xf32>
    "tpu.trace_start"() <{level = 10 : i32, message = "bqd,bkd->bqk"}> : () -> ()
    %cst_33 = arith.constant dense<0.000000e+00> : vector<2x8x8xf32>
    %56 = tpu.matmul %53, %54, %cst_33 {dimension_numbers = #tpu.dot_dimension_numbers<[2], [2], [1], [1], [0, 0, 0, 1, 1, 1], [0], [0]>} : vector<2x8x8xf32>, vector<2x8x8xf32>, vector<2x8x8xf32> -> vector<2x8x8xf32>
    "tpu.trace_stop"() : () -> ()
    %cst_34 = arith.constant 0.353553385 : f32
    %57 = vector.broadcast %cst_34 : f32 to vector<2x8x8xf32>
    %58 = arith.mulf %56, %57 : vector<2x8x8xf32>
    %59 = vector.broadcast %7 : vector<2x1x8xf32> to vector<2x8x8xf32>
    %60 = arith.addf %58, %59 : vector<2x8x8xf32>
    %cst_35 = arith.constant dense<0xFF800000> : vector<2x8xf32>
    %61 = vector.multi_reduction <maximumf>, %60, %cst_35 [2] : vector<2x8x8xf32> to vector<2x8xf32>
    %62 = vector.shape_cast %61 : vector<2x8xf32> to vector<2x8x1xf32>
    %63 = vector.broadcast %62 : vector<2x8x1xf32> to vector<2x8x8xf32>
    %64 = arith.subf %60, %63 : vector<2x8x8xf32>
    %65 = math.exp %64 : vector<2x8x8xf32>
    %cst_36 = arith.constant dense<0.000000e+00> : vector<2x8xf32>
    %66 = vector.multi_reduction <add>, %65, %cst_36 [2] : vector<2x8x8xf32> to vector<2x8xf32>
    %67 = vector.shape_cast %66 : vector<2x8xf32> to vector<2x8x1xf32>
    %68 = tpu.reciprocal %67 {approx = true} : vector<2x8x1xf32> -> vector<2x8x1xf32>
    %69 = vector.broadcast %68 : vector<2x8x1xf32> to vector<2x8x8xf32>
    %70 = arith.mulf %65, %69 : vector<2x8x8xf32>
    "tpu.trace_start"() <{level = 10 : i32, message = "bqk,bkd->bqd"}> : () -> ()
    %cst_37 = arith.constant dense<0.000000e+00> : vector<2x8x8xf32>
    %71 = tpu.matmul %70, %55, %cst_37 {dimension_numbers = #tpu.dot_dimension_numbers<[2], [1], [1], [2], [0, 0, 0, 1, 1, 2], [0], [0]>} : vector<2x8x8xf32>, vector<2x8x8xf32>, vector<2x8x8xf32> -> vector<2x8x8xf32>
    "tpu.trace_stop"() : () -> ()
    %72 = vector.extract_strided_slice %48 {offsets = [0, 0, 8], sizes = [2, 8, 8], strides = [1, 1, 1]} : vector<2x8x32xf32> to vector<2x8x8xf32>
    %73 = vector.extract_strided_slice %50 {offsets = [0, 0, 8], sizes = [2, 8, 8], strides = [1, 1, 1]} : vector<2x8x32xf32> to vector<2x8x8xf32>
    %74 = vector.extract_strided_slice %52 {offsets = [0, 0, 8], sizes = [2, 8, 8], strides = [1, 1, 1]} : vector<2x8x32xf32> to vector<2x8x8xf32>
    "tpu.trace_start"() <{level = 10 : i32, message = "bqd,bkd->bqk"}> : () -> ()
    %cst_38 = arith.constant dense<0.000000e+00> : vector<2x8x8xf32>
    %75 = tpu.matmul %72, %73, %cst_38 {dimension_numbers = #tpu.dot_dimension_numbers<[2], [2], [1], [1], [0, 0, 0, 1, 1, 1], [0], [0]>} : vector<2x8x8xf32>, vector<2x8x8xf32>, vector<2x8x8xf32> -> vector<2x8x8xf32>
    "tpu.trace_stop"() : () -> ()
    %cst_39 = arith.constant 0.353553385 : f32
    %76 = vector.broadcast %cst_39 : f32 to vector<2x8x8xf32>
    %77 = arith.mulf %75, %76 : vector<2x8x8xf32>
    %78 = vector.broadcast %7 : vector<2x1x8xf32> to vector<2x8x8xf32>
    %79 = arith.addf %77, %78 : vector<2x8x8xf32>
    %cst_40 = arith.constant dense<0xFF800000> : vector<2x8xf32>
    %80 = vector.multi_reduction <maximumf>, %79, %cst_40 [2] : vector<2x8x8xf32> to vector<2x8xf32>
    %81 = vector.shape_cast %80 : vector<2x8xf32> to vector<2x8x1xf32>
    %82 = vector.broadcast %81 : vector<2x8x1xf32> to vector<2x8x8xf32>
    %83 = arith.subf %79, %82 : vector<2x8x8xf32>
    %84 = math.exp %83 : vector<2x8x8xf32>
    %cst_41 = arith.constant dense<0.000000e+00> : vector<2x8xf32>
    %85 = vector.multi_reduction <add>, %84, %cst_41 [2] : vector<2x8x8xf32> to vector<2x8xf32>
    %86 = vector.shape_cast %85 : vector<2x8xf32> to vector<2x8x1xf32>
    %87 = tpu.reciprocal %86 {approx = true} : vector<2x8x1xf32> -> vector<2x8x1xf32>
    %88 = vector.broadcast %87 : vector<2x8x1xf32> to vector<2x8x8xf32>
    %89 = arith.mulf %84, %88 : vector<2x8x8xf32>
    "tpu.trace_start"() <{level = 10 : i32, message = "bqk,bkd->bqd"}> : () -> ()
    %cst_42 = arith.constant dense<0.000000e+00> : vector<2x8x8xf32>
    %90 = tpu.matmul %89, %74, %cst_42 {dimension_numbers = #tpu.dot_dimension_numbers<[2], [1], [1], [2], [0, 0, 0, 1, 1, 2], [0], [0]>} : vector<2x8x8xf32>, vector<2x8x8xf32>, vector<2x8x8xf32> -> vector<2x8x8xf32>
    "tpu.trace_stop"() : () -> ()
    %91 = vector.extract_strided_slice %48 {offsets = [0, 0, 16], sizes = [2, 8, 8], strides = [1, 1, 1]} : vector<2x8x32xf32> to vector<2x8x8xf32>
    %92 = vector.extract_strided_slice %50 {offsets = [0, 0, 16], sizes = [2, 8, 8], strides = [1, 1, 1]} : vector<2x8x32xf32> to vector<2x8x8xf32>
    %93 = vector.extract_strided_slice %52 {offsets = [0, 0, 16], sizes = [2, 8, 8], strides = [1, 1, 1]} : vector<2x8x32xf32> to vector<2x8x8xf32>
    "tpu.trace_start"() <{level = 10 : i32, message = "bqd,bkd->bqk"}> : () -> ()
    %cst_43 = arith.constant dense<0.000000e+00> : vector<2x8x8xf32>
    %94 = tpu.matmul %91, %92, %cst_43 {dimension_numbers = #tpu.dot_dimension_numbers<[2], [2], [1], [1], [0, 0, 0, 1, 1, 1], [0], [0]>} : vector<2x8x8xf32>, vector<2x8x8xf32>, vector<2x8x8xf32> -> vector<2x8x8xf32>
    "tpu.trace_stop"() : () -> ()
    %cst_44 = arith.constant 0.353553385 : f32
    %95 = vector.broadcast %cst_44 : f32 to vector<2x8x8xf32>
    %96 = arith.mulf %94, %95 : vector<2x8x8xf32>
    %97 = vector.broadcast %7 : vector<2x1x8xf32> to vector<2x8x8xf32>
    %98 = arith.addf %96, %97 : vector<2x8x8xf32>
    %cst_45 = arith.constant dense<0xFF800000> : vector<2x8xf32>
    %99 = vector.multi_reduction <maximumf>, %98, %cst_45 [2] : vector<2x8x8xf32> to vector<2x8xf32>
    %100 = vector.shape_cast %99 : vector<2x8xf32> to vector<2x8x1xf32>
    %101 = vector.broadcast %100 : vector<2x8x1xf32> to vector<2x8x8xf32>
    %102 = arith.subf %98, %101 : vector<2x8x8xf32>
    %103 = math.exp %102 : vector<2x8x8xf32>
    %cst_46 = arith.constant dense<0.000000e+00> : vector<2x8xf32>
    %104 = vector.multi_reduction <add>, %103, %cst_46 [2] : vector<2x8x8xf32> to vector<2x8xf32>
    %105 = vector.shape_cast %104 : vector<2x8xf32> to vector<2x8x1xf32>
    %106 = tpu.reciprocal %105 {approx = true} : vector<2x8x1xf32> -> vector<2x8x1xf32>
    %107 = vector.broadcast %106 : vector<2x8x1xf32> to vector<2x8x8xf32>
    %108 = arith.mulf %103, %107 : vector<2x8x8xf32>
    "tpu.trace_start"() <{level = 10 : i32, message = "bqk,bkd->bqd"}> : () -> ()
    %cst_47 = arith.constant dense<0.000000e+00> : vector<2x8x8xf32>
    %109 = tpu.matmul %108, %93, %cst_47 {dimension_numbers = #tpu.dot_dimension_numbers<[2], [1], [1], [2], [0, 0, 0, 1, 1, 2], [0], [0]>} : vector<2x8x8xf32>, vector<2x8x8xf32>, vector<2x8x8xf32> -> vector<2x8x8xf32>
    "tpu.trace_stop"() : () -> ()
    %110 = vector.extract_strided_slice %48 {offsets = [0, 0, 24], sizes = [2, 8, 8], strides = [1, 1, 1]} : vector<2x8x32xf32> to vector<2x8x8xf32>
    %111 = vector.extract_strided_slice %50 {offsets = [0, 0, 24], sizes = [2, 8, 8], strides = [1, 1, 1]} : vector<2x8x32xf32> to vector<2x8x8xf32>
    %112 = vector.extract_strided_slice %52 {offsets = [0, 0, 24], sizes = [2, 8, 8], strides = [1, 1, 1]} : vector<2x8x32xf32> to vector<2x8x8xf32>
    "tpu.trace_start"() <{level = 10 : i32, message = "bqd,bkd->bqk"}> : () -> ()
    %cst_48 = arith.constant dense<0.000000e+00> : vector<2x8x8xf32>
    %113 = tpu.matmul %110, %111, %cst_48 {dimension_numbers = #tpu.dot_dimension_numbers<[2], [2], [1], [1], [0, 0, 0, 1, 1, 1], [0], [0]>} : vector<2x8x8xf32>, vector<2x8x8xf32>, vector<2x8x8xf32> -> vector<2x8x8xf32>
    "tpu.trace_stop"() : () -> ()
    %cst_49 = arith.constant 0.353553385 : f32
    %114 = vector.broadcast %cst_49 : f32 to vector<2x8x8xf32>
    %115 = arith.mulf %113, %114 : vector<2x8x8xf32>
    %116 = vector.broadcast %7 : vector<2x1x8xf32> to vector<2x8x8xf32>
    %117 = arith.addf %115, %116 : vector<2x8x8xf32>
    %cst_50 = arith.constant dense<0xFF800000> : vector<2x8xf32>
    %118 = vector.multi_reduction <maximumf>, %117, %cst_50 [2] : vector<2x8x8xf32> to vector<2x8xf32>
    %119 = vector.shape_cast %118 : vector<2x8xf32> to vector<2x8x1xf32>
    %120 = vector.broadcast %119 : vector<2x8x1xf32> to vector<2x8x8xf32>
    %121 = arith.subf %117, %120 : vector<2x8x8xf32>
    %122 = math.exp %121 : vector<2x8x8xf32>
    %cst_51 = arith.constant dense<0.000000e+00> : vector<2x8xf32>
    %123 = vector.multi_reduction <add>, %122, %cst_51 [2] : vector<2x8x8xf32> to vector<2x8xf32>
    %124 = vector.shape_cast %123 : vector<2x8xf32> to vector<2x8x1xf32>
    %125 = tpu.reciprocal %124 {approx = true} : vector<2x8x1xf32> -> vector<2x8x1xf32>
    %126 = vector.broadcast %125 : vector<2x8x1xf32> to vector<2x8x8xf32>
    %127 = arith.mulf %122, %126 : vector<2x8x8xf32>
    "tpu.trace_start"() <{level = 10 : i32, message = "bqk,bkd->bqd"}> : () -> ()
    %cst_52 = arith.constant dense<0.000000e+00> : vector<2x8x8xf32>
    %128 = tpu.matmul %127, %112, %cst_52 {dimension_numbers = #tpu.dot_dimension_numbers<[2], [1], [1], [2], [0, 0, 0, 1, 1, 2], [0], [0]>} : vector<2x8x8xf32>, vector<2x8x8xf32>, vector<2x8x8xf32> -> vector<2x8x8xf32>
    "tpu.trace_stop"() : () -> ()
    %129 = tpu.concatenate %71, %90, %109, %128 in 2 : vector<2x8x8xf32>, vector<2x8x8xf32>, vector<2x8x8xf32>, vector<2x8x8xf32> -> vector<2x8x32xf32>
    %130 = vector.shape_cast %129 : vector<2x8x32xf32> to vector<16x32xf32>
    %cst_53 = arith.constant dense<0.000000e+00> : vector<16x32xf32>
    %131 = tpu.matmul %130, %40, %cst_53 {dimension_numbers = #tpu.dot_dimension_numbers<[1], [0], [0], [1], [0, 0, 1, 1], [], []>} : vector<16x32xf32>, vector<32x32xf32>, vector<16x32xf32> -> vector<16x32xf32>
    %132 = vector.broadcast %41 : vector<1x32xf32> to vector<16x32xf32>
    %133 = arith.addf %131, %132 : vector<16x32xf32>
    %c0_54 = arith.constant 0 : index
    %c0_55 = arith.constant 0 : index
    %134 = vector.load %arg15[%c0_54, %c0_55] : memref<32x32xf32, #tpu.memory_space<vmem>>, vector<32x32xf32>
    %c0_56 = arith.constant 0 : index
    %c0_57 = arith.constant 0 : index
    %135 = vector.load %arg16[%c0_56, %c0_57] : memref<1x32xf32, #tpu.memory_space<vmem>>, vector<1x32xf32>
    %c0_58 = arith.constant 0 : index
    %c0_59 = arith.constant 0 : index
    %136 = vector.load %arg17[%c0_58, %c0_59] : memref<32x64xf32, #tpu.memory_space<vmem>>, vector<32x64xf32>
    %c0_60 = arith.constant 0 : index
    %c0_61 = arith.constant 0 : index
    %137 = vector.load %arg18[%c0_60, %c0_61] : memref<1x64xf32, #tpu.memory_space<vmem>>, vector<1x64xf32>
    %c0_62 = arith.constant 0 : index
    %c0_63 = arith.constant 0 : index
    %138 = vector.load %arg19[%c0_62, %c0_63] : memref<32x32xf32, #tpu.memory_space<vmem>>, vector<32x32xf32>
    %c0_64 = arith.constant 0 : index
    %c0_65 = arith.constant 0 : index
    %139 = vector.load %arg20[%c0_64, %c0_65] : memref<1x32xf32, #tpu.memory_space<vmem>>, vector<1x32xf32>
    %cst_66 = arith.constant dense<0.000000e+00> : vector<16x32xf32>
    %140 = tpu.matmul %35, %134, %cst_66 {dimension_numbers = #tpu.dot_dimension_numbers<[1], [0], [0], [1], [0, 0, 1, 1], [], []>} : vector<16x32xf32>, vector<32x32xf32>, vector<16x32xf32> -> vector<16x32xf32>
    %141 = vector.broadcast %135 : vector<1x32xf32> to vector<16x32xf32>
    %142 = arith.addf %140, %141 : vector<16x32xf32>
    %cst_67 = arith.constant dense<0.000000e+00> : vector<16x64xf32>
    %143 = tpu.matmul %5, %136, %cst_67 {dimension_numbers = #tpu.dot_dimension_numbers<[1], [0], [0], [1], [0, 0, 1, 1], [], []>} : vector<16x32xf32>, vector<32x64xf32>, vector<16x64xf32> -> vector<16x64xf32>
    %144 = vector.broadcast %137 : vector<1x64xf32> to vector<16x64xf32>
    %145 = arith.addf %143, %144 : vector<16x64xf32>
    %146 = vector.shape_cast %142 : vector<16x32xf32> to vector<2x8x32xf32>
    %147 = vector.extract_strided_slice %145 {offsets = [0, 0], sizes = [16, 32], strides = [1, 1]} : vector<16x64xf32> to vector<16x32xf32>
    %148 = vector.shape_cast %147 : vector<16x32xf32> to vector<2x8x32xf32>
    %149 = vector.extract_strided_slice %145 {offsets = [0, 32], sizes = [16, 32], strides = [1, 1]} : vector<16x64xf32> to vector<16x32xf32>
    %150 = vector.shape_cast %149 : vector<16x32xf32> to vector<2x8x32xf32>
    %151 = vector.extract_strided_slice %146 {offsets = [0, 0, 0], sizes = [2, 8, 8], strides = [1, 1, 1]} : vector<2x8x32xf32> to vector<2x8x8xf32>
    %152 = vector.extract_strided_slice %148 {offsets = [0, 0, 0], sizes = [2, 8, 8], strides = [1, 1, 1]} : vector<2x8x32xf32> to vector<2x8x8xf32>
    %153 = vector.extract_strided_slice %150 {offsets = [0, 0, 0], sizes = [2, 8, 8], strides = [1, 1, 1]} : vector<2x8x32xf32> to vector<2x8x8xf32>
    "tpu.trace_start"() <{level = 10 : i32, message = "bqd,bkd->bqk"}> : () -> ()
    %cst_68 = arith.constant dense<0.000000e+00> : vector<2x8x8xf32>
    %154 = tpu.matmul %151, %152, %cst_68 {dimension_numbers = #tpu.dot_dimension_numbers<[2], [2], [1], [1], [0, 0, 0, 1, 1, 1], [0], [0]>} : vector<2x8x8xf32>, vector<2x8x8xf32>, vector<2x8x8xf32> -> vector<2x8x8xf32>
    "tpu.trace_stop"() : () -> ()
    %cst_69 = arith.constant 0.353553385 : f32
    %155 = vector.broadcast %cst_69 : f32 to vector<2x8x8xf32>
    %156 = arith.mulf %154, %155 : vector<2x8x8xf32>
    %157 = vector.broadcast %7 : vector<2x1x8xf32> to vector<2x8x8xf32>
    %158 = arith.addf %156, %157 : vector<2x8x8xf32>
    %cst_70 = arith.constant dense<0xFF800000> : vector<2x8xf32>
    %159 = vector.multi_reduction <maximumf>, %158, %cst_70 [2] : vector<2x8x8xf32> to vector<2x8xf32>
    %160 = vector.shape_cast %159 : vector<2x8xf32> to vector<2x8x1xf32>
    %161 = vector.broadcast %160 : vector<2x8x1xf32> to vector<2x8x8xf32>
    %162 = arith.subf %158, %161 : vector<2x8x8xf32>
    %163 = math.exp %162 : vector<2x8x8xf32>
    %cst_71 = arith.constant dense<0.000000e+00> : vector<2x8xf32>
    %164 = vector.multi_reduction <add>, %163, %cst_71 [2] : vector<2x8x8xf32> to vector<2x8xf32>
    %165 = vector.shape_cast %164 : vector<2x8xf32> to vector<2x8x1xf32>
    %166 = tpu.reciprocal %165 {approx = true} : vector<2x8x1xf32> -> vector<2x8x1xf32>
    %167 = vector.broadcast %166 : vector<2x8x1xf32> to vector<2x8x8xf32>
    %168 = arith.mulf %163, %167 : vector<2x8x8xf32>
    "tpu.trace_start"() <{level = 10 : i32, message = "bqk,bkd->bqd"}> : () -> ()
    %cst_72 = arith.constant dense<0.000000e+00> : vector<2x8x8xf32>
    %169 = tpu.matmul %168, %153, %cst_72 {dimension_numbers = #tpu.dot_dimension_numbers<[2], [1], [1], [2], [0, 0, 0, 1, 1, 2], [0], [0]>} : vector<2x8x8xf32>, vector<2x8x8xf32>, vector<2x8x8xf32> -> vector<2x8x8xf32>
    "tpu.trace_stop"() : () -> ()
    %170 = vector.extract_strided_slice %146 {offsets = [0, 0, 8], sizes = [2, 8, 8], strides = [1, 1, 1]} : vector<2x8x32xf32> to vector<2x8x8xf32>
    %171 = vector.extract_strided_slice %148 {offsets = [0, 0, 8], sizes = [2, 8, 8], strides = [1, 1, 1]} : vector<2x8x32xf32> to vector<2x8x8xf32>
    %172 = vector.extract_strided_slice %150 {offsets = [0, 0, 8], sizes = [2, 8, 8], strides = [1, 1, 1]} : vector<2x8x32xf32> to vector<2x8x8xf32>
    "tpu.trace_start"() <{level = 10 : i32, message = "bqd,bkd->bqk"}> : () -> ()
    %cst_73 = arith.constant dense<0.000000e+00> : vector<2x8x8xf32>
    %173 = tpu.matmul %170, %171, %cst_73 {dimension_numbers = #tpu.dot_dimension_numbers<[2], [2], [1], [1], [0, 0, 0, 1, 1, 1], [0], [0]>} : vector<2x8x8xf32>, vector<2x8x8xf32>, vector<2x8x8xf32> -> vector<2x8x8xf32>
    "tpu.trace_stop"() : () -> ()
    %cst_74 = arith.constant 0.353553385 : f32
    %174 = vector.broadcast %cst_74 : f32 to vector<2x8x8xf32>
    %175 = arith.mulf %173, %174 : vector<2x8x8xf32>
    %176 = vector.broadcast %7 : vector<2x1x8xf32> to vector<2x8x8xf32>
    %177 = arith.addf %175, %176 : vector<2x8x8xf32>
    %cst_75 = arith.constant dense<0xFF800000> : vector<2x8xf32>
    %178 = vector.multi_reduction <maximumf>, %177, %cst_75 [2] : vector<2x8x8xf32> to vector<2x8xf32>
    %179 = vector.shape_cast %178 : vector<2x8xf32> to vector<2x8x1xf32>
    %180 = vector.broadcast %179 : vector<2x8x1xf32> to vector<2x8x8xf32>
    %181 = arith.subf %177, %180 : vector<2x8x8xf32>
    %182 = math.exp %181 : vector<2x8x8xf32>
    %cst_76 = arith.constant dense<0.000000e+00> : vector<2x8xf32>
    %183 = vector.multi_reduction <add>, %182, %cst_76 [2] : vector<2x8x8xf32> to vector<2x8xf32>
    %184 = vector.shape_cast %183 : vector<2x8xf32> to vector<2x8x1xf32>
    %185 = tpu.reciprocal %184 {approx = true} : vector<2x8x1xf32> -> vector<2x8x1xf32>
    %186 = vector.broadcast %185 : vector<2x8x1xf32> to vector<2x8x8xf32>
    %187 = arith.mulf %182, %186 : vector<2x8x8xf32>
    "tpu.trace_start"() <{level = 10 : i32, message = "bqk,bkd->bqd"}> : () -> ()
    %cst_77 = arith.constant dense<0.000000e+00> : vector<2x8x8xf32>
    %188 = tpu.matmul %187, %172, %cst_77 {dimension_numbers = #tpu.dot_dimension_numbers<[2], [1], [1], [2], [0, 0, 0, 1, 1, 2], [0], [0]>} : vector<2x8x8xf32>, vector<2x8x8xf32>, vector<2x8x8xf32> -> vector<2x8x8xf32>
    "tpu.trace_stop"() : () -> ()
    %189 = vector.extract_strided_slice %146 {offsets = [0, 0, 16], sizes = [2, 8, 8], strides = [1, 1, 1]} : vector<2x8x32xf32> to vector<2x8x8xf32>
    %190 = vector.extract_strided_slice %148 {offsets = [0, 0, 16], sizes = [2, 8, 8], strides = [1, 1, 1]} : vector<2x8x32xf32> to vector<2x8x8xf32>
    %191 = vector.extract_strided_slice %150 {offsets = [0, 0, 16], sizes = [2, 8, 8], strides = [1, 1, 1]} : vector<2x8x32xf32> to vector<2x8x8xf32>
    "tpu.trace_start"() <{level = 10 : i32, message = "bqd,bkd->bqk"}> : () -> ()
    %cst_78 = arith.constant dense<0.000000e+00> : vector<2x8x8xf32>
    %192 = tpu.matmul %189, %190, %cst_78 {dimension_numbers = #tpu.dot_dimension_numbers<[2], [2], [1], [1], [0, 0, 0, 1, 1, 1], [0], [0]>} : vector<2x8x8xf32>, vector<2x8x8xf32>, vector<2x8x8xf32> -> vector<2x8x8xf32>
    "tpu.trace_stop"() : () -> ()
    %cst_79 = arith.constant 0.353553385 : f32
    %193 = vector.broadcast %cst_79 : f32 to vector<2x8x8xf32>
    %194 = arith.mulf %192, %193 : vector<2x8x8xf32>
    %195 = vector.broadcast %7 : vector<2x1x8xf32> to vector<2x8x8xf32>
    %196 = arith.addf %194, %195 : vector<2x8x8xf32>
    %cst_80 = arith.constant dense<0xFF800000> : vector<2x8xf32>
    %197 = vector.multi_reduction <maximumf>, %196, %cst_80 [2] : vector<2x8x8xf32> to vector<2x8xf32>
    %198 = vector.shape_cast %197 : vector<2x8xf32> to vector<2x8x1xf32>
    %199 = vector.broadcast %198 : vector<2x8x1xf32> to vector<2x8x8xf32>
    %200 = arith.subf %196, %199 : vector<2x8x8xf32>
    %201 = math.exp %200 : vector<2x8x8xf32>
    %cst_81 = arith.constant dense<0.000000e+00> : vector<2x8xf32>
    %202 = vector.multi_reduction <add>, %201, %cst_81 [2] : vector<2x8x8xf32> to vector<2x8xf32>
    %203 = vector.shape_cast %202 : vector<2x8xf32> to vector<2x8x1xf32>
    %204 = tpu.reciprocal %203 {approx = true} : vector<2x8x1xf32> -> vector<2x8x1xf32>
    %205 = vector.broadcast %204 : vector<2x8x1xf32> to vector<2x8x8xf32>
    %206 = arith.mulf %201, %205 : vector<2x8x8xf32>
    "tpu.trace_start"() <{level = 10 : i32, message = "bqk,bkd->bqd"}> : () -> ()
    %cst_82 = arith.constant dense<0.000000e+00> : vector<2x8x8xf32>
    %207 = tpu.matmul %206, %191, %cst_82 {dimension_numbers = #tpu.dot_dimension_numbers<[2], [1], [1], [2], [0, 0, 0, 1, 1, 2], [0], [0]>} : vector<2x8x8xf32>, vector<2x8x8xf32>, vector<2x8x8xf32> -> vector<2x8x8xf32>
    "tpu.trace_stop"() : () -> ()
    %208 = vector.extract_strided_slice %146 {offsets = [0, 0, 24], sizes = [2, 8, 8], strides = [1, 1, 1]} : vector<2x8x32xf32> to vector<2x8x8xf32>
    %209 = vector.extract_strided_slice %148 {offsets = [0, 0, 24], sizes = [2, 8, 8], strides = [1, 1, 1]} : vector<2x8x32xf32> to vector<2x8x8xf32>
    %210 = vector.extract_strided_slice %150 {offsets = [0, 0, 24], sizes = [2, 8, 8], strides = [1, 1, 1]} : vector<2x8x32xf32> to vector<2x8x8xf32>
    "tpu.trace_start"() <{level = 10 : i32, message = "bqd,bkd->bqk"}> : () -> ()
    %cst_83 = arith.constant dense<0.000000e+00> : vector<2x8x8xf32>
    %211 = tpu.matmul %208, %209, %cst_83 {dimension_numbers = #tpu.dot_dimension_numbers<[2], [2], [1], [1], [0, 0, 0, 1, 1, 1], [0], [0]>} : vector<2x8x8xf32>, vector<2x8x8xf32>, vector<2x8x8xf32> -> vector<2x8x8xf32>
    "tpu.trace_stop"() : () -> ()
    %cst_84 = arith.constant 0.353553385 : f32
    %212 = vector.broadcast %cst_84 : f32 to vector<2x8x8xf32>
    %213 = arith.mulf %211, %212 : vector<2x8x8xf32>
    %214 = vector.broadcast %7 : vector<2x1x8xf32> to vector<2x8x8xf32>
    %215 = arith.addf %213, %214 : vector<2x8x8xf32>
    %cst_85 = arith.constant dense<0xFF800000> : vector<2x8xf32>
    %216 = vector.multi_reduction <maximumf>, %215, %cst_85 [2] : vector<2x8x8xf32> to vector<2x8xf32>
    %217 = vector.shape_cast %216 : vector<2x8xf32> to vector<2x8x1xf32>
    %218 = vector.broadcast %217 : vector<2x8x1xf32> to vector<2x8x8xf32>
    %219 = arith.subf %215, %218 : vector<2x8x8xf32>
    %220 = math.exp %219 : vector<2x8x8xf32>
    %cst_86 = arith.constant dense<0.000000e+00> : vector<2x8xf32>
    %221 = vector.multi_reduction <add>, %220, %cst_86 [2] : vector<2x8x8xf32> to vector<2x8xf32>
    %222 = vector.shape_cast %221 : vector<2x8xf32> to vector<2x8x1xf32>
    %223 = tpu.reciprocal %222 {approx = true} : vector<2x8x1xf32> -> vector<2x8x1xf32>
    %224 = vector.broadcast %223 : vector<2x8x1xf32> to vector<2x8x8xf32>
    %225 = arith.mulf %220, %224 : vector<2x8x8xf32>
    "tpu.trace_start"() <{level = 10 : i32, message = "bqk,bkd->bqd"}> : () -> ()
    %cst_87 = arith.constant dense<0.000000e+00> : vector<2x8x8xf32>
    %226 = tpu.matmul %225, %210, %cst_87 {dimension_numbers = #tpu.dot_dimension_numbers<[2], [1], [1], [2], [0, 0, 0, 1, 1, 2], [0], [0]>} : vector<2x8x8xf32>, vector<2x8x8xf32>, vector<2x8x8xf32> -> vector<2x8x8xf32>
    "tpu.trace_stop"() : () -> ()
    %227 = tpu.concatenate %169, %188, %207, %226 in 2 : vector<2x8x8xf32>, vector<2x8x8xf32>, vector<2x8x8xf32>, vector<2x8x8xf32> -> vector<2x8x32xf32>
    %228 = vector.shape_cast %227 : vector<2x8x32xf32> to vector<16x32xf32>
    %cst_88 = arith.constant dense<0.000000e+00> : vector<16x32xf32>
    %229 = tpu.matmul %228, %138, %cst_88 {dimension_numbers = #tpu.dot_dimension_numbers<[1], [0], [0], [1], [0, 0, 1, 1], [], []>} : vector<16x32xf32>, vector<32x32xf32>, vector<16x32xf32> -> vector<16x32xf32>
    %230 = vector.broadcast %139 : vector<1x32xf32> to vector<16x32xf32>
    %231 = arith.addf %229, %230 : vector<16x32xf32>
    %c0_89 = arith.constant 0 : index
    %c0_90 = arith.constant 0 : index
    %232 = vector.load %arg21[%c0_89, %c0_90] : memref<32x32xf32, #tpu.memory_space<vmem>>, vector<32x32xf32>
    %c0_91 = arith.constant 0 : index
    %c0_92 = arith.constant 0 : index
    %233 = vector.load %arg22[%c0_91, %c0_92] : memref<1x32xf32, #tpu.memory_space<vmem>>, vector<1x32xf32>
    %c0_93 = arith.constant 0 : index
    %c0_94 = arith.constant 0 : index
    %234 = vector.load %arg23[%c0_93, %c0_94] : memref<32x1xf32, #tpu.memory_space<vmem>>, vector<32x1xf32>
    %c0_95 = arith.constant 0 : index
    %c0_96 = arith.constant 0 : index
    %235 = memref.load %arg24[%c0_95, %c0_96] : memref<1x1xf32, #tpu.memory_space<smem>>
    %236 = tpu.concatenate %133, %231 in 0 : vector<16x32xf32>, vector<16x32xf32> -> vector<32x32xf32>
    %cst_97 = arith.constant dense<0.000000e+00> : vector<32x32xf32>
    %237 = tpu.matmul %236, %232, %cst_97 {dimension_numbers = #tpu.dot_dimension_numbers<[1], [0], [0], [1], [0, 0, 1, 1], [], []>} : vector<32x32xf32>, vector<32x32xf32>, vector<32x32xf32> -> vector<32x32xf32>
    %238 = vector.broadcast %233 : vector<1x32xf32> to vector<32x32xf32>
    %239 = arith.addf %237, %238 : vector<32x32xf32>
    %240 = math.tanh %239 : vector<32x32xf32>
    %cst_98 = arith.constant dense<0.000000e+00> : vector<32x1xf32>
    %241 = tpu.matmul %240, %234, %cst_98 {dimension_numbers = #tpu.dot_dimension_numbers<[1], [0], [0], [1], [0, 0, 1, 1], [], []>} : vector<32x32xf32>, vector<32x1xf32>, vector<32x1xf32> -> vector<32x1xf32>
    %242 = vector.broadcast %235 : f32 to vector<32x1xf32>
    %243 = arith.addf %241, %242 : vector<32x1xf32>
    %244 = vector.extract_strided_slice %243 {offsets = [0, 0], sizes = [16, 1], strides = [1, 1]} : vector<32x1xf32> to vector<16x1xf32>
    %245 = vector.extract_strided_slice %243 {offsets = [16, 0], sizes = [16, 1], strides = [1, 1]} : vector<32x1xf32> to vector<16x1xf32>
    %246 = arith.maximumf %244, %245 : vector<16x1xf32>
    %247 = arith.subf %244, %246 : vector<16x1xf32>
    %248 = math.exp %247 : vector<16x1xf32>
    %249 = arith.subf %245, %246 : vector<16x1xf32>
    %250 = math.exp %249 : vector<16x1xf32>
    %251 = arith.addf %248, %250 : vector<16x1xf32>
    %252 = tpu.reciprocal %251 {approx = true} : vector<16x1xf32> -> vector<16x1xf32>
    %253 = vector.broadcast %248 : vector<16x1xf32> to vector<16x32xf32>
    %254 = arith.mulf %253, %133 : vector<16x32xf32>
    %255 = vector.broadcast %250 : vector<16x1xf32> to vector<16x32xf32>
    %256 = arith.mulf %255, %231 : vector<16x32xf32>
    %257 = arith.addf %254, %256 : vector<16x32xf32>
    %258 = vector.broadcast %252 : vector<16x1xf32> to vector<16x32xf32>
    %259 = arith.mulf %257, %258 : vector<16x32xf32>
    %c0_99 = arith.constant 0 : index
    %c0_100 = arith.constant 0 : index
    %260 = vector.load %arg25[%c0_99, %c0_100] : memref<32x128xf32, #tpu.memory_space<vmem>>, vector<32x128xf32>
    %cst_101 = arith.constant dense<0.000000e+00> : vector<16x128xf32>
    %261 = tpu.matmul %259, %260, %cst_101 {dimension_numbers = #tpu.dot_dimension_numbers<[1], [0], [0], [1], [0, 0, 1, 1], [], []>} : vector<16x32xf32>, vector<32x128xf32>, vector<16x128xf32> -> vector<16x128xf32>
    %c0_102 = arith.constant 0 : index
    %c0_103 = arith.constant 0 : index
    %262 = vector.load %arg26[%c0_102, %c0_103] : memref<1x128xf32, #tpu.memory_space<vmem>>, vector<1x128xf32>
    %263 = vector.broadcast %262 : vector<1x128xf32> to vector<16x128xf32>
    %264 = arith.addf %261, %263 : vector<16x128xf32>
    %c0_104 = arith.constant 0 : index
    %c0_105 = arith.constant 0 : index
    %c0_106 = arith.constant 0 : index
    %265 = vector.load %arg4[%c0_104, %c0_105, %c0_106] : memref<2x8x128xf32, #tpu.memory_space<vmem>>, vector<2x8x128xf32>
    %266 = vector.shape_cast %265 : vector<2x8x128xf32> to vector<16x128xf32>
    %267 = arith.addf %264, %266 : vector<16x128xf32>
    %268 = vector.shape_cast %267 : vector<16x128xf32> to vector<2x8x128xf32>
    %c0_107 = arith.constant 0 : index
    %c0_108 = arith.constant 0 : index
    %c0_109 = arith.constant 0 : index
    %269 = vector.load %arg27[%c0_107, %c0_108, %c0_109] : memref<2x8x128xf32, #tpu.memory_space<vmem>>, vector<2x8x128xf32>
    tpu.vector_store %arg27[%c0_107, %c0_108, %c0_109], %268 {strides = array<i32>} : memref<2x8x128xf32, #tpu.memory_space<vmem>>, vector<2x8x128xf32>,
    return
  }
}

</mosaic_0001>

<bundles_post_ra>
// kernel: tpu_custom_call.1
= control target key start
LH: loop header
LB: loop body
LE: loop exit
PB: predicated region body
PF: predicated region fallthrough
CT: control target
= control target key end

     0   :  { %s6398_s0 = inlined_call_operand.hbm [shape: f32[2,8,32], index: 0, kind: input, shape index: {}]   ;;  %s6399_s1 = inlined_call_operand.hbm [shape: f32[2,8,32], index: 1, kind: input, shape index: {}]   ;;  %s6400_s2 = inlined_call_operand.hbm [shape: f32[2,8,32], index: 2, kind: input, shape index: {}]   ;;  %s6401_s3 = inlined_call_operand.hbm [shape: f32[2,8], index: 3, kind: input, shape index: {}]   ;;  %s6402_s4 = inlined_call_operand.hbm [shape: f32[2,8,128], index: 4, kind: input, shape index: {}]   ;;  %s6403_s5 = inlined_call_operand.vmem [shape: f32[32,32], index: 5, kind: input, shape index: {}]   ;;  %s6404_s6 = inlined_call_operand.hbm [shape: f32[1,32], index: 6, kind: input, shape index: {}]   ;;  %s6405_s7 = inlined_call_operand.vmem [shape: f32[32,1], index: 7, kind: input, shape index: {}]   ;;  %s6406_s8 = inlined_call_operand.<no memory space> [shape: f32[1,1], index: 8, kind: input, shape index: {}]   ;;  %s6407_s9 = inlined_call_operand.vmem [shape: f32[32,32], index: 9, kind: input, shape index: {}]   ;;  %s6408_s10 = inlined_call_operand.hbm [shape: f32[1,32], index: 10, kind: input, shape index: {}]   ;;  %s6409_s11 = inlined_call_operand.vmem [shape: f32[32,64], index: 11, kind: input, shape index: {}]   ;;  %s6410_s12 = inlined_call_operand.hbm [shape: f32[1,64], index: 12, kind: input, shape index: {}]   ;;  %s6411_s13 = inlined_call_operand.hbm [shape: f32[32,32], index: 13, kind: input, shape index: {}]   ;;  %s6412_s14 = inlined_call_operand.hbm [shape: f32[1,32], index: 14, kind: input, shape index: {}]   ;;  %s6413_s15 = inlined_call_operand.hbm [shape: f32[32,32], index: 15, kind: input, shape index: {}]   ;;  %s6414_s16 = inlined_call_operand.hbm [shape: f32[1,32], index: 16, kind: input, shape index: {}]   ;;  %s6415_s17 = inlined_call_operand.vmem [shape: f32[32,64], index: 17, kind: input, shape index: {}]   ;;  %s6416_s18 = inlined_call_operand.hbm [shape: f32[1,64], index: 18, kind: input, shape index: {}]   ;;  %s6417_s19 = inlined_call_operand.hbm [shape: f32[32,32], index: 19, kind: input, shape index: {}]   ;;  %s6418_s20 = inlined_call_operand.hbm [shape: f32[1,32], index: 20, kind: input, shape index: {}]   ;;  %s6419_s21 = inlined_call_operand.hbm [shape: f32[32,32], index: 21, kind: input, shape index: {}]   ;;  %s6420_s22 = inlined_call_operand.hbm [shape: f32[1,32], index: 22, kind: input, shape index: {}]   ;;  %s6421_s23 = inlined_call_operand.vmem [shape: f32[32,1], index: 23, kind: input, shape index: {}]   ;;  %s6422_s24 = inlined_call_operand.<no memory space> [shape: f32[1,1], index: 24, kind: input, shape index: {}]   ;;  %s6423_s25 = inlined_call_operand.vmem [shape: f32[32,128], index: 25, kind: input, shape index: {}]   ;;  %s6424_s26 = inlined_call_operand.vmem [shape: f32[1,128], index: 26, kind: input, shape index: {}]   ;;  %s6425_s27 = inlined_call_operand.hbm [shape: f32[2,8,128], index: 27, kind: output, shape index: {}]  }
   0x1   :  { %6442 = sst [smem:[#allocation42_spill]] %s6398_s0 }
   0x2   :  { %6443 = sst [smem:[#allocation43_spill]] %s6399_s1 }
   0x3   :  { %6444 = sst [smem:[#allocation44_spill]] %s6400_s2 }
   0x4   :  { %6445 = sst [smem:[#allocation45_spill]] %s6401_s3 }
   0x5   :  { %6446 = sst [smem:[#allocation46_spill]] %s6402_s4 }
   0x6   :  { %6447 = sst [smem:[#allocation47_spill]] %s6403_s5 }
   0x7   :  { %6448 = sst [smem:[#allocation48_spill]] %s6404_s6 }
   0x8   :  { %6449 = sst [smem:[#allocation49_spill]] %s6405_s7 }
   0x9   :  { %6450 = sst [smem:[#allocation50_spill]] %s6406_s8 }
   0xa   :  { %6451 = sst [smem:[#allocation51_spill]] %s6407_s9 }
   0xb   :  { %6452 = sst [smem:[#allocation52_spill]] %s6408_s10 }
   0xc   :  { %6453 = sst [smem:[#allocation53_spill]] %s6409_s11 }
   0xd   :  { %6454 = sst [smem:[#allocation54_spill]] %s6425_s27 }
   0xe   :  { %34 = vsyncpa [#allocation5], 0 }
   0xf   :  { %35 = vsyncpa [#allocation8], 0 }
  0x10   :  { %36 = vsyncpa [#allocation11], 0 }
  0x11   :  { %37 = vsyncpa [#allocation14], 0 }
  0x12   :  { %38 = vsyncpa [#allocation17], 0 }
  0x13   :  { %39 = vsyncpa [#allocation20], 0 }
  0x14   :  { %40 = vsyncpa [#allocation23], 0 }
  0x15   :  { %41 = vsyncpa [#allocation26], 0 }
  0x16   :  { %42 = vsyncpa [#allocation29], 0 }
  0x17   :  { %43 = vsyncpa [#allocation6], 0  ;;  %s5436_s7 = smov [#allocation7]   ;;  %s5437_s8 = smov [#allocation10]  }
  0x18   :  { %s61_s4 = sshll.u32 %s5436_s7, 4  ;;  %s86_s30 = sshll.u32 %s5437_s8, 4  ;;  %s62_s4 = int_to_ptr.vmem [resolvable:$true] %s61_s4  ;;  %s87_s30 = int_to_ptr.vmem [resolvable:$true] %s86_s30 }
  0x19   :  { %s6455_s28 = sld [smem:[#allocation43_spill]] }
  0x1f   :  { %s5020_s0 = scalar_lea.hbm %s6455_s28, 256 }
  0x20   :  { %p5021_p0 = scmp.ne.s32.totalorder %s6455_s28, %s5020_s0  ;;  %p5024_p1 = scmp.lt.u32.totalorder %s5020_s0, %s6455_s28 }
  0x22   :  { %p5026_p2 = pnand %p5024_p1, %p5021_p0 }
  0x24   :  { %5029 = shalt.err (!%p5026_p2)
}
  0x25   :  { %s5030_s11 = scalar_lea.vmem %s62_s4, 256  ;;  %p5035_p4 = scmp.lt.s32.totalorder %s62_s4, %s62_s4 }
  0x26   :  { %p5031_p3 = scmp.ne.s32.totalorder %s62_s4, %s5030_s11  ;;  %p5036_p5 = scmp.lt.s32.totalorder %s5030_s11, %s5030_s11 }
  0x28   :  { %p5037_p6 = por %p5036_p5, %p5035_p4 }
  0x2a   :  { %p5038_p7 = pnand %p5037_p6, %p5031_p3 }
  0x2c   :  { %5041 = shalt.err (!%p5038_p7)
}
  0x2d   :  { %s6438_s2 = smov 128   ;;  %s6440_s3 = smov 8  }
  0x2e   :  { %67 = dma.hbm_to_vmem [thread:$0]  %s6455_s28, 256, %s62_s4, [#allocation8], %s6438_s2, %s6438_s2, %s6440_s3  }
  0x2f   :  { %s6456_s0 = sld [smem:[#allocation45_spill]] }
  0x35   :  { %s5042_s10 = scalar_lea.hbm %s6456_s0, 32 }
  0x36   :  { %p5043_p8 = scmp.ne.s32.totalorder %s6456_s0, %s5042_s10  ;;  %p5046_p9 = scmp.lt.u32.totalorder %s5042_s10, %s6456_s0 }
  0x38   :  { %p5048_p10 = pnand %p5046_p9, %p5043_p8 }
  0x3a   :  { %5051 = shalt.err (!%p5048_p10)
}
  0x3b   :  { %s5052_s27 = scalar_lea.vmem %s87_s30, 32  ;;  %p5057_p12 = scmp.lt.s32.totalorder %s87_s30, %s87_s30 }
  0x3c   :  { %p5053_p11 = scmp.ne.s32.totalorder %s87_s30, %s5052_s27  ;;  %p5058_p13 = scmp.lt.s32.totalorder %s5052_s27, %s5052_s27 }
  0x3e   :  { %p5059_p0 = por %p5058_p13, %p5057_p12 }
  0x40   :  { %p5060_p1 = pnand %p5059_p0, %p5053_p11 }
  0x42   :  { %5063 = shalt.err (!%p5060_p1)
}
  0x43   :  { %89 = dma.hbm_to_vmem [thread:$0]  %s6456_s0, 32, %s87_s30, [#allocation11]  }
  0x44   :  { %s5440_s7 = smov [#allocation13]   ;;  %s5441_s9 = smov [#allocation16]  }
  0x45   :  { %s110_s8 = sshll.u32 %s5440_s7, 4  ;;  %s138_s5 = sshll.u32 %s5441_s9, 4  ;;  %s111_s8 = int_to_ptr.vmem [resolvable:$true] %s110_s8  ;;  %s139_s5 = int_to_ptr.vmem [resolvable:$true] %s138_s5 }
  0x46   :  { %s6457_s1 = sld [smem:[#allocation48_spill]] }
  0x4c   :  { %s5064_s6 = scalar_lea.hbm %s6457_s1, 16 }
  0x4d   :  { %p5065_p2 = scmp.ne.s32.totalorder %s6457_s1, %s5064_s6  ;;  %p5068_p3 = scmp.lt.u32.totalorder %s5064_s6, %s6457_s1 }
  0x4f   :  { %p5070_p4 = pnand %p5068_p3, %p5065_p2 }
  0x51   :  { %5073 = shalt.err (!%p5070_p4)
}
  0x52   :  { %s5074_s30 = scalar_lea.vmem %s111_s8, 16  ;;  %s5078_s0 = scalar_lea.vmem %s111_s8, 32 }
  0x53   :  { %p5075_p5 = scmp.ne.s32.totalorder %s111_s8, %s5074_s30  ;;  %p5079_p6 = scmp.lt.s32.totalorder %s111_s8, %s111_s8 }
  0x54   :  { %p5080_p7 = scmp.lt.s32.totalorder %s5078_s0, %s5074_s30 }
  0x56   :  { %p5081_p8 = por %p5080_p7, %p5079_p6 }
  0x58   :  { %p5082_p9 = pnand %p5081_p8, %p5075_p5 }
  0x5a   :  { %5085 = shalt.err (!%p5082_p9)
}
  0x5b   :  { %113 = dma.hbm_to_vmem [thread:$0]  %s6457_s1, 16, %s111_s8, [#allocation14]  }
  0x5c   :  { %s5086_s9 = scalar_lea.hbm %s6410_s12, 16 }
  0x5d   :  { %p5087_p10 = scmp.ne.s32.totalorder %s6410_s12, %s5086_s9  ;;  %p5090_p11 = scmp.lt.u32.totalorder %s5086_s9, %s6410_s12 }
  0x5f   :  { %p5092_p12 = pnand %p5090_p11, %p5087_p10 }
  0x61   :  { %5095 = shalt.err (!%p5092_p12)
}
  0x62   :  { %s5096_s11 = scalar_lea.vmem %s139_s5, 16  ;;  %s5100_s27 = scalar_lea.vmem %s139_s5, 32 }
  0x63   :  { %p5097_p13 = scmp.ne.s32.totalorder %s139_s5, %s5096_s11  ;;  %p5101_p0 = scmp.lt.s32.totalorder %s139_s5, %s139_s5 }
  0x64   :  { %p5102_p1 = scmp.lt.s32.totalorder %s5100_s27, %s5096_s11 }
  0x66   :  { %p5103_p2 = por %p5102_p1, %p5101_p0 }
  0x68   :  { %p5104_p3 = pnand %p5103_p2, %p5097_p13 }
  0x6a   :  { %5107 = shalt.err (!%p5104_p3)
}
  0x6b   :  { %141 = dma.hbm_to_vmem [thread:$0]  %s6410_s12, 16, %s139_s5, [#allocation17]  }
  0x6c   :  { %s5442_s30 = smov [#allocation19]   ;;  %s5443_s4 = smov [#allocation22]  }
  0x6d   :  { %s160_s0 = sshll.u32 %s5442_s30, 4  ;;  %s182_s28 = sshll.u32 %s5443_s4, 4  ;;  %s161_s0 = int_to_ptr.vmem [resolvable:$true] %s160_s0  ;;  %s183_s28 = int_to_ptr.vmem [resolvable:$true] %s182_s28 }
  0x6e   :  { %s5108_s9 = scalar_lea.hbm %s6412_s14, 16 }
  0x6f   :  { %p5109_p4 = scmp.ne.s32.totalorder %s6412_s14, %s5108_s9  ;;  %p5112_p5 = scmp.lt.u32.totalorder %s5108_s9, %s6412_s14 }
  0x71   :  { %p5114_p6 = pnand %p5112_p5, %p5109_p4 }
  0x73   :  { %5117 = shalt.err (!%p5114_p6)
}
  0x74   :  { %s5118_s12 = scalar_lea.vmem %s161_s0, 16  ;;  %s5122_s5 = scalar_lea.vmem %s161_s0, 32 }
  0x75   :  { %p5119_p7 = scmp.ne.s32.totalorder %s161_s0, %s5118_s12  ;;  %p5123_p8 = scmp.lt.s32.totalorder %s161_s0, %s161_s0 }
  0x76   :  { %p5124_p9 = scmp.lt.s32.totalorder %s5122_s5, %s5118_s12 }
  0x78   :  { %p5125_p10 = por %p5124_p9, %p5123_p8 }
  0x7a   :  { %p5126_p11 = pnand %p5125_p10, %p5119_p7 }
  0x7c   :  { %5129 = shalt.err (!%p5126_p11)
}
  0x7d   :  { %163 = dma.hbm_to_vmem [thread:$0]  %s6412_s14, 16, %s161_s0, [#allocation20]  }
  0x7e   :  { %s5130_s30 = scalar_lea.hbm %s6414_s16, 16 }
  0x7f   :  { %p5131_p12 = scmp.ne.s32.totalorder %s6414_s16, %s5130_s30  ;;  %p5134_p13 = scmp.lt.u32.totalorder %s5130_s30, %s6414_s16 }
  0x81   :  { %p5136_p0 = pnand %p5134_p13, %p5131_p12 }
  0x83   :  { %5139 = shalt.err (!%p5136_p0)
}
  0x84   :  { %s5140_s3 = scalar_lea.vmem %s183_s28, 16  ;;  %s5144_s10 = scalar_lea.vmem %s183_s28, 32 }
  0x85   :  { %p5141_p1 = scmp.ne.s32.totalorder %s183_s28, %s5140_s3  ;;  %p5145_p2 = scmp.lt.s32.totalorder %s183_s28, %s183_s28 }
  0x86   :  { %p5146_p3 = scmp.lt.s32.totalorder %s5144_s10, %s5140_s3 }
  0x88   :  { %p5147_p4 = por %p5146_p3, %p5145_p2 }
  0x8a   :  { %p5148_p5 = pnand %p5147_p4, %p5141_p1 }
  0x8c   :  { %5151 = shalt.err (!%p5148_p5)
}
  0x8d   :  { %185 = dma.hbm_to_vmem [thread:$0]  %s6414_s16, 16, %s183_s28, [#allocation23]  }
  0x8e   :  { %s5444_s29 = smov [#allocation25]   ;;  %s5445_s12 = smov [#allocation28]  }
  0x8f   :  { %s203_s6 = sshll.u32 %s5444_s29, 4  ;;  %s225_s5 = sshll.u32 %s5445_s12, 4  ;;  %s204_s6 = int_to_ptr.vmem [resolvable:$true] %s203_s6  ;;  %s5684_s5 = int_to_ptr.vmem [resolvable:$true] %s225_s5 }
  0x90   :  { %s5152_s8 = scalar_lea.hbm %s6417_s19, 512 }
  0x91   :  { %p5153_p6 = scmp.ne.s32.totalorder %s6417_s19, %s5152_s8  ;;  %p5156_p7 = scmp.lt.u32.totalorder %s5152_s8, %s6417_s19 }
  0x93   :  { %p5158_p8 = pnand %p5156_p7, %p5153_p6 }
  0x95   :  { %5161 = shalt.err (!%p5158_p8)
}
  0x96   :  { %s5162_s16 = scalar_lea.vmem %s204_s6, 512  ;;  %p5167_p10 = scmp.lt.s32.totalorder %s204_s6, %s204_s6 }
  0x97   :  { %p5163_p9 = scmp.ne.s32.totalorder %s204_s6, %s5162_s16  ;;  %p5168_p11 = scmp.lt.s32.totalorder %s5162_s16, %s5162_s16 }
  0x99   :  { %p5169_p12 = por %p5168_p11, %p5167_p10 }
  0x9b   :  { %p5170_p13 = pnand %p5169_p12, %p5163_p9 }
  0x9d   :  { %5173 = shalt.err (!%p5170_p13)
}
  0x9e   :  { %s6458_s28 = smov 8   ;;  %s6459_s7 = smov 128  }
  0x9f   :  { %209 = dma.hbm_to_vmem [thread:$0]  %s6417_s19, 512, %s204_s6, [#allocation26], %s6459_s7, %s6459_s7, %s6458_s28  }
  0xa0   :  { %s5174_s0 = scalar_lea.hbm %s6419_s21, 512 }
  0xa1   :  { %p5175_p0 = scmp.ne.s32.totalorder %s6419_s21, %s5174_s0  ;;  %p5178_p1 = scmp.lt.u32.totalorder %s5174_s0, %s6419_s21 }
  0xa3   :  { %p5180_p2 = pnand %p5178_p1, %p5175_p0 }
  0xa5   :  { %5183 = shalt.err (!%p5180_p2)
}
  0xa6   :  { %s5184_s8 = scalar_lea.vmem %s5684_s5, 512  ;;  %p5189_p4 = scmp.lt.s32.totalorder %s5684_s5, %s5684_s5 }
  0xa7   :  { %p5185_p3 = scmp.ne.s32.totalorder %s5684_s5, %s5184_s8  ;;  %p5190_p5 = scmp.lt.s32.totalorder %s5184_s8, %s5184_s8 }
  0xa9   :  { %p5191_p6 = por %p5190_p5, %p5189_p4 }
  0xab   :  { %p5192_p7 = pnand %p5191_p6, %p5185_p3 }
  0xad   :  { %5195 = shalt.err (!%p5192_p7)
}
  0xae   :  { %231 = dma.hbm_to_vmem [thread:$0]  %s6419_s21, 512, %s5684_s5, [#allocation29], %s6459_s7, %s6459_s7, %s6458_s28  }
  0xaf   :  { %s5446_s1 = smov [#allocation4]   ;;  %s5447_s4 = smov [#allocation9]  }
  0xb0   :  { %s49_s30 = sshll.u32 %s5446_s1, 4  ;;  %s73_s2 = sshll.u32 %s5447_s4, 4  ;;  %s50_s30 = int_to_ptr.vmem [resolvable:$true] %s49_s30  ;;  %s5721_s2 = int_to_ptr.vmem [resolvable:$true] %s73_s2 }
  0xb1   :  { %s6460_s3 = sld [smem:[#allocation42_spill]] }
  0xb7   :  { %s5196_s10 = scalar_lea.hbm %s6460_s3, 256 }
  0xb8   :  { %p5197_p8 = scmp.ne.s32.totalorder %s6460_s3, %s5196_s10  ;;  %p5200_p9 = scmp.lt.u32.totalorder %s5196_s10, %s6460_s3 }
  0xba   :  { %p5202_p10 = pnand %p5200_p9, %p5197_p8 }
  0xbc   :  { %5205 = shalt.err (!%p5202_p10)
}
  0xbd   :  { %s5206_s21 = scalar_lea.vmem %s50_s30, 256  ;;  %p5211_p12 = scmp.lt.s32.totalorder %s50_s30, %s50_s30 }
  0xbe   :  { %p5207_p11 = scmp.ne.s32.totalorder %s50_s30, %s5206_s21  ;;  %p5212_p13 = scmp.lt.s32.totalorder %s5206_s21, %s5206_s21 }
  0xc0   :  { %p5213_p0 = por %p5212_p13, %p5211_p12 }
  0xc2   :  { %p5214_p1 = pnand %p5213_p0, %p5207_p11 }
  0xc4   :  { %5217 = shalt.err (!%p5214_p1)
}
  0xc5   :  { %55 = dma.hbm_to_vmem [thread:$0]  %s6460_s3, 256, %s50_s30, [#allocation5], %s6459_s7, %s6459_s7, %s6458_s28  }
  0xc6   :  { %s6461_s19 = sld [smem:[#allocation44_spill]] }
  0xcc   :  { %s5218_s6 = scalar_lea.hbm %s6461_s19, 256 }
  0xcd   :  { %p5219_p2 = scmp.ne.s32.totalorder %s6461_s19, %s5218_s6  ;;  %p5222_p3 = scmp.lt.u32.totalorder %s5218_s6, %s6461_s19 }
  0xcf   :  { %p5224_p4 = pnand %p5222_p3, %p5219_p2 }
  0xd1   :  { %5227 = shalt.err (!%p5224_p4)
}
  0xd2   :  { %s5228_s10 = scalar_lea.vmem %s5721_s2, 256  ;;  %p5233_p6 = scmp.lt.s32.totalorder %s5721_s2, %s5721_s2 }
  0xd3   :  { %p5229_p5 = scmp.ne.s32.totalorder %s5721_s2, %s5228_s10  ;;  %p5234_p7 = scmp.lt.s32.totalorder %s5228_s10, %s5228_s10 }
  0xd5   :  { %p5235_p8 = por %p5234_p7, %p5233_p6 }
  0xd7   :  { %p5236_p9 = pnand %p5235_p8, %p5229_p5 }
  0xd9   :  { %5239 = shalt.err (!%p5236_p9)
}
  0xda   :  { %79 = dma.hbm_to_vmem [thread:$0]  %s6461_s19, 256, %s5721_s2, [#allocation8], %s6459_s7, %s6459_s7, %s6458_s28  }
  0xdb   :  { %s5448_s14 = smov [#allocation12]   ;;  %s5449_s29 = smov [#allocation15]  }
  0xdc   :  { %s95_s0 = sshll.u32 %s5448_s14, 4  ;;  %s126_s12 = sshll.u32 %s5449_s29, 4  ;;  %s96_s0 = int_to_ptr.vmem [resolvable:$true] %s95_s0  ;;  %s127_s12 = int_to_ptr.vmem [resolvable:$true] %s126_s12 }
  0xdd   :  { %s6462_s11 = sld [smem:[#allocation46_spill]] }
  0xe3   :  { %s5240_s27 = scalar_lea.hbm %s6462_s11, 256 }
  0xe4   :  { %p5241_p10 = scmp.ne.s32.totalorder %s6462_s11, %s5240_s27  ;;  %p5244_p11 = scmp.lt.u32.totalorder %s5240_s27, %s6462_s11 }
  0xe6   :  { %p5246_p12 = pnand %p5244_p11, %p5241_p10 }
  0xe8   :  { %5249 = shalt.err (!%p5246_p12)
}
  0xe9   :  { %s5250_s2 = scalar_lea.vmem %s96_s0, 256  ;;  %p5255_p0 = scmp.lt.s32.totalorder %s96_s0, %s96_s0 }
  0xea   :  { %p5251_p13 = scmp.ne.s32.totalorder %s96_s0, %s5250_s2  ;;  %p5256_p1 = scmp.lt.s32.totalorder %s5250_s2, %s5250_s2 }
  0xec   :  { %p5257_p2 = por %p5256_p1, %p5255_p0 }
  0xee   :  { %p5258_p3 = pnand %p5257_p2, %p5251_p13 }
  0xf0   :  { %5261 = shalt.err (!%p5258_p3)
}
  0xf1   :  { %101 = dma.hbm_to_vmem [thread:$0]  %s6462_s11, 256, %s96_s0, [#allocation11], %s6459_s7, %s6459_s7, %s6458_s28  }
  0xf2   :  { %s6463_s30 = sld [smem:[#allocation52_spill]] }
  0xf8   :  { %s5262_s3 = scalar_lea.hbm %s6463_s30, 16 }
  0xf9   :  { %p5263_p4 = scmp.ne.s32.totalorder %s6463_s30, %s5262_s3  ;;  %p5266_p5 = scmp.lt.u32.totalorder %s5262_s3, %s6463_s30 }
  0xfb   :  { %p5268_p6 = pnand %p5266_p5, %p5263_p4 }
  0xfd   :  { %5271 = shalt.err (!%p5268_p6)
}
  0xfe   :  { %s5272_s27 = scalar_lea.vmem %s127_s12, 16  ;;  %s5276_s8 = scalar_lea.vmem %s127_s12, 32 }
  0xff   :  { %p5273_p7 = scmp.ne.s32.totalorder %s127_s12, %s5272_s27  ;;  %p5277_p8 = scmp.lt.s32.totalorder %s127_s12, %s127_s12 }
 0x100   :  { %p5278_p9 = scmp.lt.s32.totalorder %s5276_s8, %s5272_s27 }
 0x102   :  { %p5279_p10 = por %p5278_p9, %p5277_p8 }
 0x104   :  { %p5280_p11 = pnand %p5279_p10, %p5273_p7 }
 0x106   :  { %5283 = shalt.err (!%p5280_p11)
}
 0x107   :  { %129 = dma.hbm_to_vmem [thread:$0]  %s6463_s30, 16, %s127_s12, [#allocation14]  }
 0x108   :  { %s5450_s6 = smov [#allocation18]   ;;  %s5451_s4 = smov [#allocation21]  }
 0x109   :  { %s147_s1 = sshll.u32 %s5450_s6, 4  ;;  %s169_s2 = sshll.u32 %s5451_s4, 4  ;;  %s148_s1 = int_to_ptr.vmem [resolvable:$true] %s147_s1  ;;  %s5785_s2 = int_to_ptr.vmem [resolvable:$true] %s169_s2 }
 0x10a   :  { %s5284_s9 = scalar_lea.hbm %s6411_s13, 512 }
 0x10b   :  { %p5285_p12 = scmp.ne.s32.totalorder %s6411_s13, %s5284_s9  ;;  %p5288_p13 = scmp.lt.u32.totalorder %s5284_s9, %s6411_s13 }
 0x10d   :  { %p5290_p0 = pnand %p5288_p13, %p5285_p12 }
 0x10f   :  { %5293 = shalt.err (!%p5290_p0)
}
 0x110   :  { %s5294_s12 = scalar_lea.vmem %s148_s1, 512  ;;  %p5299_p2 = scmp.lt.s32.totalorder %s148_s1, %s148_s1 }
 0x111   :  { %p5295_p1 = scmp.ne.s32.totalorder %s148_s1, %s5294_s12  ;;  %p5300_p3 = scmp.lt.s32.totalorder %s5294_s12, %s5294_s12 }
 0x113   :  { %p5301_p4 = por %p5300_p3, %p5299_p2 }
 0x115   :  { %p5302_p5 = pnand %p5301_p4, %p5295_p1 }
 0x117   :  { %5305 = shalt.err (!%p5302_p5)
}
 0x118   :  { %153 = dma.hbm_to_vmem [thread:$0]  %s6411_s13, 512, %s148_s1, [#allocation17], %s6459_s7, %s6459_s7, %s6458_s28  }
 0x119   :  { %s5306_s8 = scalar_lea.hbm %s6413_s15, 512 }
 0x11a   :  { %p5307_p6 = scmp.ne.s32.totalorder %s6413_s15, %s5306_s8  ;;  %p5310_p7 = scmp.lt.u32.totalorder %s5306_s8, %s6413_s15 }
 0x11c   :  { %p5312_p8 = pnand %p5310_p7, %p5307_p6 }
 0x11e   :  { %5315 = shalt.err (!%p5312_p8)
}
 0x11f   :  { %s5316_s19 = scalar_lea.vmem %s5785_s2, 512  ;;  %p5321_p10 = scmp.lt.s32.totalorder %s5785_s2, %s5785_s2 }
 0x120   :  { %p5317_p9 = scmp.ne.s32.totalorder %s5785_s2, %s5316_s19  ;;  %p5322_p11 = scmp.lt.s32.totalorder %s5316_s19, %s5316_s19 }
 0x122   :  { %p5323_p12 = por %p5322_p11, %p5321_p10 }
 0x124   :  { %p5324_p13 = pnand %p5323_p12, %p5317_p9 }
 0x126   :  { %5327 = shalt.err (!%p5324_p13)
}
 0x127   :  { %175 = dma.hbm_to_vmem [thread:$0]  %s6413_s15, 512, %s5785_s2, [#allocation20], %s6459_s7, %s6459_s7, %s6458_s28  }
 0x128   :  { %s5452_s16 = smov [#allocation24]   ;;  %s5453_s10 = smov [#allocation27]  }
 0x129   :  { %s194_s9 = sshll.u32 %s5452_s16, 4  ;;  %s216_s3 = sshll.u32 %s5453_s10, 4  ;;  %s195_s9 = int_to_ptr.vmem [resolvable:$true] %s194_s9  ;;  %s217_s3 = int_to_ptr.vmem [resolvable:$true] %s216_s3 }
 0x12a   :  { %s5328_s12 = scalar_lea.hbm %s6416_s18, 16 }
 0x12b   :  { %p5329_p0 = scmp.ne.s32.totalorder %s6416_s18, %s5328_s12  ;;  %p5332_p1 = scmp.lt.u32.totalorder %s5328_s12, %s6416_s18 }
 0x12d   :  { %p5334_p2 = pnand %p5332_p1, %p5329_p0 }
 0x12f   :  { %5337 = shalt.err (!%p5334_p2)
}
 0x130   :  { %s5338_s15 = scalar_lea.vmem %s195_s9, 16  ;;  %s5342_s2 = scalar_lea.vmem %s195_s9, 32 }
 0x131   :  { %p5339_p3 = scmp.ne.s32.totalorder %s195_s9, %s5338_s15  ;;  %p5343_p4 = scmp.lt.s32.totalorder %s195_s9, %s195_s9 }
 0x132   :  { %p5344_p5 = scmp.lt.s32.totalorder %s5342_s2, %s5338_s15 }
 0x134   :  { %p5345_p6 = por %p5344_p5, %p5343_p4 }
 0x136   :  { %p5346_p7 = pnand %p5345_p6, %p5339_p3 }
 0x138   :  { %5349 = shalt.err (!%p5346_p7)
}
 0x139   :  { %197 = dma.hbm_to_vmem [thread:$0]  %s6416_s18, 16, %s195_s9, [#allocation23]  }
 0x13a   :  { %s5350_s4 = scalar_lea.hbm %s6418_s20, 16 }
 0x13b   :  { %p5351_p8 = scmp.ne.s32.totalorder %s6418_s20, %s5350_s4  ;;  %p5354_p9 = scmp.lt.u32.totalorder %s5350_s4, %s6418_s20 }
 0x13d   :  { %p5356_p10 = pnand %p5354_p9, %p5351_p8 }
 0x13f   :  { %5359 = shalt.err (!%p5356_p10)
}
 0x140   :  { %s5360_s10 = scalar_lea.vmem %s217_s3, 16  ;;  %s5364_s14 = scalar_lea.vmem %s217_s3, 32 }
 0x141   :  { %p5361_p11 = scmp.ne.s32.totalorder %s217_s3, %s5360_s10  ;;  %p5365_p12 = scmp.lt.s32.totalorder %s217_s3, %s217_s3 }
 0x142   :  { %p5366_p13 = scmp.lt.s32.totalorder %s5364_s14, %s5360_s10 }
 0x144   :  { %p5367_p0 = por %p5366_p13, %p5365_p12 }
 0x146   :  { %p5368_p1 = pnand %p5367_p0, %p5361_p11 }
 0x148   :  { %5371 = shalt.err (!%p5368_p1)
}
 0x149   :  { %219 = dma.hbm_to_vmem [thread:$0]  %s6418_s20, 16, %s217_s3, [#allocation26]  }
 0x14a   :  { %s5454_s29 = smov [#allocation30]   ;;  %s5372_s5 = scalar_lea.hbm %s6420_s22, 16 }
 0x14b   :  { %s238_s12 = sshll.u32 %s5454_s29, 4  ;;  %p5373_p2 = scmp.ne.s32.totalorder %s6420_s22, %s5372_s5  ;;  %s239_s12 = int_to_ptr.vmem [resolvable:$true] %s238_s12 }
 0x14c   :  { %p5376_p3 = scmp.lt.u32.totalorder %s5372_s5, %s6420_s22 }
 0x14e   :  { %p5378_p4 = pnand %p5376_p3, %p5373_p2 }
 0x150   :  { %5381 = shalt.err (!%p5378_p4)
}
 0x151   :  { %s5382_s0 = scalar_lea.vmem %s239_s12, 16  ;;  %s5386_s20 = scalar_lea.vmem %s239_s12, 32 }
 0x152   :  { %p5383_p5 = scmp.ne.s32.totalorder %s239_s12, %s5382_s0  ;;  %p5387_p6 = scmp.lt.s32.totalorder %s239_s12, %s239_s12 }
 0x153   :  { %p5388_p7 = scmp.lt.s32.totalorder %s5386_s20, %s5382_s0 }
 0x155   :  { %p5389_p8 = por %p5388_p7, %p5387_p6 }
 0x157   :  { %p5390_p9 = pnand %p5389_p8, %p5383_p5 }
 0x159   :  { %5393 = shalt.err (!%p5390_p9)
}
 0x15a   :  { %241 = dma.hbm_to_vmem [thread:$0]  %s6420_s22, 16, %s239_s12, [#allocation29]  }
 0x15b   :  { %5416 = dma.done.wait [#allocation5], 256  }
 0x15c   :  { %5417 = vsyncadd [#allocation5], 4294967040 }
 0x15d   :  { %5418 = dma.done.wait [#allocation8], 512  }
 0x15e   :  { %5419 = vsyncadd [#allocation8], 4294966784 }
 0x15f   :  { %5420 = dma.done.wait [#allocation11], 288  }
 0x160   :  { %5421 = vsyncadd [#allocation11], 4294967008 }
 0x161   :  { %5422 = dma.done.wait [#allocation14], 32  }
 0x162   :  { %5423 = vsyncadd [#allocation14], 4294967264 }
 0x163   :  { %5424 = dma.done.wait [#allocation17], 528  }
 0x164   :  { %5425 = vsyncadd [#allocation17], 4294966768 }
 0x165   :  { %5426 = dma.done.wait [#allocation20], 528  }
 0x166   :  { %5427 = vsyncadd [#allocation20], 4294966768 }
 0x167   :  { %5428 = dma.done.wait [#allocation23], 32  }
 0x168   :  { %5429 = vsyncadd [#allocation23], 4294967264 }
 0x169   :  { %5430 = dma.done.wait [#allocation26], 528  }
 0x16a   :  { %5431 = vsyncadd [#allocation26], 4294966768 }
 0x16b   :  { %5432 = dma.done.wait [#allocation29], 528  }
 0x16c   :  { %5433 = vsyncadd [#allocation29], 4294966768  ;;  %vm347_vm0 = vcmask 261120   ;;  %s6464_s4 = sld [smem:[#allocation47_spill]]  ;;  %v5870_v5 = vld [vmem:[#allocation4] sm:$0xff]  ;;  %v5874_v7 = vld [vmem:[#allocation4 + $0x8] sm:$0xff] }
 0x16d   :  { %4508 = vmatprep.mubr.msk.f32.mxu0 %vm347_vm0, %v5870_v5  ;;  %v5876_v8 = vld [vmem:[#allocation7] sm:$0xff]  ;;  %v5882_v9 = vld [vmem:[#allocation7 + $0x8] sm:$0xff]  ;;  %s6465_s29 = sld [smem:[#allocation49_spill]]  ;;  %v4275_v16 = vld [vmem:[#allocation13] ss:$0 sm:$0xff]  ;;  %v5455_v29 = vmov 0  }
 0x16e   :  { %4914 = vset.pattern.permute.xlu1 %v5455_v29  ;;  %4915 = vset.pattern.permute.xlu0 %v5455_v29  ;;  %s6466_s0 = sld [smem:[#allocation50_spill]]  ;;  %s6467_s11 = sld [smem:[#allocation53_spill]]  ;;  %vm5457_vm1 = vmmov 0   ;;  %vm792_vm2 = vcmask 64512   ;;  %vm2161_vm3 = vcmask 130048   ;;  %vm2164_vm4 = vcmask 195584  }
 0x16f   :  { %s6468_s13 = sld [smem:[#allocation51_spill]]  ;;  %s5459_s5 = smov 96  }
 0x170   :  { %s5460_s27 = smov 120   ;;  %s5461_s15 = smov 88  }
 0x171   :  { %s5462_s2 = smov 112   ;;  %s5463_s8 = smov 80  }
 0x172   :  { %v331_v0 = vld [vmem:[%s6464_s4] sm:$0xff]  ;;  %v332_v1 = vld [vmem:[%s6464_s4 + $0x8] sm:$0xff]  ;;  %v333_v2 = vld [vmem:[%s6464_s4 + $0x10] sm:$0xff]  ;;  %s5465_s20 = smov 72   ;;  %s5466_s3 = smov 16  }
 0x173   :  { %v4793_v3 = vpack.c.bf16 %v332_v1, %v331_v0  ;;  %v334_v4 = vld [vmem:[%s6464_s4 + $0x18] sm:$0xff]  ;;  %v336_v10 = vld [vmem:[%s6465_s29] sm:$0xff]  ;;  %v337_v11 = vld [vmem:[%s6465_s29 + $0x8] sm:$0xff]  ;;  %s5467_s19 = smov 24   ;;  %s5468_s22 = smov [#allocation31]  }
 0x174   :  { %v4797_v6 = vpack.c.bf16 %v334_v4, %v333_v2  ;;  %v4801_v12 = vpack.c.bf16 %v337_v11, %v336_v10  ;;  %v338_v13 = vld [vmem:[%s6465_s29 + $0x10] sm:$0xff]  ;;  %v339_v14 = vld [vmem:[%s6465_s29 + $0x18] sm:$0xff]  ;;  %v449_v32 = vstv %s6466_s0  ;;  %v608_v55 = vld [vmem:[%s6467_s11] sm:$0xff]  ;;  %s5464_s0 = smov 104   ;;  %s4254_s6 = sshll.u32 %s5468_s22, 4  ;;  %s4255_s6 = int_to_ptr.vmem [resolvable:$true] %s4254_s6 }
 0x175   :  { %4794 = vmatprep.subr.bf16.mxu0 %v4793_v3  ;;  %v4805_v15 = vpack.c.bf16 %v339_v14, %v338_v13  ;;  %v609_v56 = vld [vmem:[%s6467_s11 + $0x8] sm:$0xff]  ;;  %v603_v57 = vld [vmem:[%s6468_s13] sm:$0xff]  ;;  %v610_v61 = vld [vmem:[%s6467_s11 + $0x10] sm:$0xff]  ;;  %s5394_s4 = scalar_lea.vmem %s4255_s6, 256  ;;  %p5399_p11 = scmp.lt.s32.totalorder %s4255_s6, %s4255_s6 }
 0x176   :  { %4796 = vmatpush3.bf16.msra.mxu0 %v4793_v3  ;;  %4802 = vmatprep.subr.bf16.mxu1 %v4801_v12  ;;  %v4817_v58 = vpack.c.bf16 %v609_v56, %v608_v55  ;;  %v604_v59 = vld [vmem:[%s6468_s13 + $0x8] sm:$0xff]  ;;  %v611_v62 = vld [vmem:[%s6467_s11 + $0x18] sm:$0xff]  ;;  %v605_v1 = vld [vmem:[%s6468_s13 + $0x10] sm:$0xff]  ;;  %p5395_p10 = scmp.ne.s32.totalorder %s4255_s6, %s5394_s4  ;;  %p5400_p12 = scmp.lt.s32.totalorder %s5394_s4, %s5394_s4 }
 0x177   :  { %4798 = vmatprep.subr.bf16.mxu0 %v4797_v6  ;;  %4804 = vmatpush3.bf16.msra.mxu1 %v4801_v12  ;;  %v4809_v60 = vpack.c.bf16 %v604_v59, %v603_v57  ;;  %v4821_v0 = vpack.c.bf16 %v611_v62, %v610_v61  ;;  %v606_v2 = vld [vmem:[%s6468_s13 + $0x18] sm:$0xff]  ;;  %v5931_v10 = vld [vmem:[#allocation9 + $0x8] sm:$0xff] }
 0x178   :  { %4806 = vmatprep.subr.bf16.mxu1 %v4805_v15  ;;  %v4813_v4 = vpack.c.bf16 %v606_v2, %v605_v1  ;;  %p5401_p13 = por %p5400_p12, %p5399_p11 }
 0x17a   :  { %4800 = vmatpush3.bf16.msra.mxu0 %v4797_v6  ;;  %v5929_v6 = vld [vmem:[#allocation9] sm:$0xff]  ;;  %p5402_p0 = pnand %p5401_p13, %p5395_p10 }
 0x17b   :  { %4808 = vmatpush3.bf16.msra.mxu1 %v4805_v15  ;;  %4810 = vmatprep.subr.bf16.mxu0 %v4809_v60 }
 0x17c   :  { %4818 = vmatprep.subr.bf16.mxu1 %v4817_v58 }
 0x17d   :  { %4509 = vmatmul.mubr.msk.f32.vlgmr.msra.gmra.mrb[0].mxu0 %vm347_vm0, %v5874_v7 }
 0x17e   :  { %4511 = vmatprep.mubr.msk.f32.mxu0 %vm347_vm0, %v5876_v8  ;;  %4812 = vmatpush3.bf16.msra.mxu0 %v4809_v60 }
 0x17f   :  { %4814 = vmatprep.subr.bf16.mxu0 %v4813_v4 }
 0x181   :  { %4512 = vmatmul.mubr.msk.f32.gmra.mrb[2].mxu0 %vm347_vm0, %v5882_v9 }
 0x182   :  { %4816 = vmatpush3.bf16.msra.mxu0 %v4813_v4  ;;  %4536 = vmatprep.mubr.msk.f32.mxu0 %vm347_vm0, %v5929_v6 }
 0x185   :  { %4537 = vmatmul.mubr.msk.f32.vlgmr.msra.gmra.mrb[4].mxu0 %vm347_vm0, %v5931_v10 }
 0x250   :  { %v4510_v17 = vpop.f32.mrb[0].mxu0 }
 0x251   :  { %v432_v18 = vadd.f32 %v4510_v17, %v4275_v16  ;;  %v426_v19 = vpop.f32.mrb[1].mxu0 }
 0x252   :  { %v427_v20 = vadd.f32 %v4275_v16, %v426_v19 }
 0x254   :  { %4916 = vtanh.f32 %v427_v20  ;;  %v4513_v21 = vpop.f32.mrb[2].mxu0 }
 0x255   :  { %4918 = vtanh.f32 %v432_v18  ;;  %v442_v22 = vadd.f32 %v4513_v21, %v4275_v16  ;;  %v436_v23 = vpop.f32.mrb[3].mxu0 }
 0x256   :  { %v437_v24 = vadd.f32 %v4275_v16, %v436_v23 }
 0x258   :  { %4920 = vtanh.f32 %v437_v24 }
 0x259   :  { %4922 = vtanh.f32 %v442_v22 }
 0x25e   :  { %v4917_v25 = vpop.eup %4916 }
 0x25f   :  { %v4919_v26 = vpop.eup %4918  ;;  %4522 = vmatprep.mubr.msk.f32.mxu1 %vm347_vm0, %v4917_v25  ;;  %v4284_v25 = vld [vmem:[#allocation15] ss:$0 sm:$0xff] }
 0x260   :  { %4523 = vmatmul.mubr.msk.f32.vlgmr.msra.gmra.mrb[0].mxu1 %vm347_vm0, %v4919_v26 }
 0x261   :  { %4820 = vmatpush3.bf16.msra.mxu1 %v4817_v58 }
 0x262   :  { %v4921_v27 = vpop.eup %4920  ;;  %4822 = vmatprep.subr.bf16.mxu1 %v4821_v0 }
 0x263   :  { %v4923_v28 = vpop.eup %4922  ;;  %4525 = vmatprep.mubr.msk.f32.mxu1 %vm347_vm0, %v4921_v27 }
 0x264   :  { %4526 = vmatmul.mubr.msk.f32.gmra.mrb[2].mxu1 %vm347_vm0, %v4923_v28 }
 0x265   :  { %4824 = vmatpush3.bf16.msra.mxu1 %v4821_v0 }
 0x333   :  { %v4524_v30 = vpop.f32.mrb[0].mxu1 }
 0x334   :  { %v528_v31 = vpop.f32.mrb[1].mxu1  ;;  %v534_v34 = vadd.f32 %v4524_v30, %v449_v32 }
 0x335   :  { %v529_v37 = vadd.f32 %v528_v31, %v449_v32 }
 0x337   :  { %v4527_v33 = vpop.f32.mrb[2].mxu1 }
 0x338   :  { %v544_v35 = vadd.f32 %v4527_v33, %v449_v32  ;;  %v538_v36 = vpop.f32.mrb[3].mxu1 }
 0x339   :  { %v539_v38 = vadd.f32 %v538_v36, %v449_v32  ;;  %v5458_v32 = vmov 1966171168  }
 0x33a   :  { %v548_v39 = vmax.f32 %v534_v34, %v544_v35  ;;  %v318_v33 = vunpack.c.l.s4 %v5458_v32 }
 0x33b   :  { %v547_v40 = vmax.f32 %v529_v37, %v539_v38 }
 0x33c   :  { %v550_v41 = vsub.f32 %v534_v34, %v548_v39  ;;  %v556_v42 = vsub.f32 %v544_v35, %v548_v39  ;;  %v320_v34 = vlaneseq  ;;  %v319_v35 = vunpack.c.0.s8 %v318_v33 }
 0x33d   :  { %v549_v43 = vsub.f32 %v529_v37, %v547_v40  ;;  %v555_v44 = vsub.f32 %v539_v38, %v547_v40  ;;  %v4274_v37 = vld.sshfl [vmem:[#allocation10] sm:$0x11 pattern:$0x75316420] }
 0x33e   :  { %v553_v45 = vmul.f32 1.442695, %v550_v41  ;;  %v559_v46 = vmul.f32 1.442695, %v556_v42  ;;  %v321_v36 = vshrl.u32 %v320_v34, 7  ;;  %v316_v38 = vcombine.high %v4274_v37, %v4274_v37 }
 0x33f   :  { %v551_v47 = vmul.f32 1.442695, %v549_v43  ;;  %v557_v48 = vmul.f32 1.442695, %v555_v44 }
 0x340   :  { %4924 = vpow2.f32 %v553_v45  ;;  %v322_v39 = vsub.s32 %v319_v35, %v321_v36  ;;  %v949_v41 = vsub.s32 0, %v321_v36 }
 0x341   :  { %4926 = vpow2.f32 %v559_v46 }
 0x342   :  { %4928 = vpow2.f32 %v551_v47  ;;  %v330_v40 = vrot.slane %v316_v38, %v322_v39  ;;  %v323_v42 = vrot.slane %v4274_v37, %v322_v39 }
 0x343   :  { %4930 = vpow2.f32 %v557_v48 }
 0x344   :  { %v5977_v43 = vrot.slane %v330_v40, %v949_v41  ;;  %v5979_v45 = vrot.slane %v323_v42, %v949_v41 }
 0x34a   :  { %v4925_v49 = vpop.eup %4924 }
 0x34b   :  { %v4927_v50 = vpop.eup %4926  ;;  %572 = vperm.xlu1 %4914, %v4925_v49  }
 0x34c   :  { %v4929_v51 = vpop.eup %4928  ;;  %v562_v52 = vadd.f32 %v4927_v50, %v4925_v49 }
 0x34d   :  { %v4931_v53 = vpop.eup %4930  ;;  %567 = vperm.xlu0 %4915, %v4929_v51  }
 0x34e   :  { %4932 = vrcp.f32 %v562_v52  ;;  %v561_v54 = vadd.f32 %v4931_v53, %v4929_v51 }
 0x34f   :  { %584 = vperm.xlu1 %4914, %v4927_v50  }
 0x350   :  { %4934 = vrcp.f32 %v561_v54 }
 0x351   :  { %579 = vperm.xlu0 %4915, %v4931_v53  }
 0x358   :  { %v4933_v63 = vpop.eup %4932 }
 0x359   :  { %598 = vperm.xlu1 %4914, %v4933_v63  }
 0x35a   :  { %v4935_v3 = vpop.eup %4934 }
 0x35b   :  { %593 = vperm.xlu0 %4915, %v4935_v3  }
 0x3ca   :  { %v573_v12 = vpop.permute.xlu1 %572 }
 0x3cb   :  { %v576_v18 = vmul.f32 %v573_v12, %v5874_v7  ;;  %v4287_v7 = vld [vmem:[#allocation16] ss:$0 sm:$0xff] }
 0x3cc   :  { %v568_v11 = vpop.permute.xlu0 %567 }
 0x3cd   :  { %v575_v17 = vmul.f32 %v568_v11, %v5870_v5 }
 0x3ce   :  { %v585_v14 = vpop.permute.xlu1 %584 }
 0x3cf   :  { %v588_v16 = vmul.f32 %v585_v14, %v5882_v9  ;;  %v5456_v9 = vmov 0.0  }
 0x3d0   :  { %v580_v13 = vpop.permute.xlu0 %579  ;;  %4555 = vmatprep.subr.mxu1 %v5456_v9  ;;  %4550 = vmatprep.subr.mxu0 %v5456_v9 }
 0x3d1   :  { %v587_v15 = vmul.f32 %v580_v13, %v5876_v8  ;;  %v590_v21 = vadd.f32 %v588_v16, %v576_v18  ;;  %v4538_v8 = vpop.f32.mrb[4].mxu0  ;;  %4552 = vmatprep.mubr.msk.f32.mxu0 %vm5457_vm1, %v5456_v9 }
 0x3d2   :  { %v696_v5 = vpop.f32.mrb[5].mxu0  ;;  %v5959_v30 = vadd.f32 %v4538_v8, %v4284_v25 }
 0x3d3   :  { %v589_v20 = vadd.f32 %v587_v15, %v575_v17  ;;  %v5961_v31 = vadd.f32 %v4284_v25, %v696_v5 }
 0x3d8   :  { %v599_v19 = vpop.permute.xlu1 %598 }
 0x3d9   :  { %v5943_v24 = vmul.f32 %v599_v19, %v590_v21 }
 0x3da   :  { %v594_v22 = vpop.permute.xlu0 %593 }
 0x3db   :  { %v5941_v23 = vmul.f32 %v594_v22, %v589_v20 }
 0x3dd   :  { %4547 = vmatprep.mubr.msk.f32.mxu1 %vm347_vm0, %v5941_v23 }
 0x3de   :  { %4548 = vmatmul.mubr.msk.f32.vlgmr.msra.gmra.mrb[4].mxu1 %vm347_vm0, %v5943_v24 }
 0x3df   :  { %4557 = vmatprep.mubr.msk.f32.mxu1 %vm5457_vm1, %v5456_v9 }
 0x4b1   :  { %v4549_v26 = vpop.f32.mrb[4].mxu1 }
 0x4b2   :  { %v5955_v27 = vadd.f32 %v4549_v26, %v4287_v7  ;;  %v783_v28 = vpop.f32.mrb[5].mxu1 }
 0x4b3   :  { %v5957_v29 = vadd.f32 %v4287_v7, %v783_v28 }
 0x4b4   :  { %4556 = vmatpush3.xpose.msk.msra.mxu1 %vm792_vm2, %v5955_v27 }
 0x4b5   :  { %4551 = vmatpush3.xpose.msk.msra.mxu0 %vm792_vm2, %v5957_v29  ;;  %4565 = vmatprep.subr.mxu1 %v5456_v9 }
 0x4b6   :  { %4560 = vmatprep.subr.mxu0 %v5456_v9 }
 0x4b7   :  { %4558 = vmatmul.mubr.msk.f32.vlgmr.msra.gmra.mrb[6].mxu1 %vm792_vm2, %v5959_v30 }
 0x4b8   :  { %4553 = vmatmul.mubr.msk.f32.vlgmr.msra.gmra.mrb[6].mxu0 %vm792_vm2, %v5961_v31  ;;  %4567 = vmatprep.mubr.msk.f32.mxu1 %vm5457_vm1, %v5456_v9 }
 0x4b9   :  { %4562 = vmatprep.mubr.msk.f32.mxu0 %vm5457_vm1, %v5456_v9 }
 0x58a   :  { %v941_v44 = vpop.f32.mrb[6].mxu1 }
 0x58b   :  { %v946_v46 = vmul.f32 0.35355338, %v941_v44  ;;  %v865_v47 = vpop.f32.mrb[6].mxu0  ;;  %v4559_v48 = vpop.f32.mrb[7].mxu1 }
 0x58c   :  { %v945_v49 = vmul.f32 0.35355338, %v865_v47  ;;  %v4554_v50 = vpop.f32.mrb[7].mxu0 }
 0x58d   :  { %v958_v51 = vadd.f32 %v5977_v43, %v946_v46 }
 0x58e   :  { %v957_v52 = vadd.f32 %v5979_v45, %v945_v49 }
 0x58f   :  { %v962_v53 = vsel %vm792_vm2, %v958_v51, -inf }
 0x590   :  { %963 = vmax.xlane.f32.xlu1 %v962_v53  ;;  %v959_v54 = vsel %vm792_vm2, %v957_v52, -inf }
 0x591   :  { %960 = vmax.xlane.f32.xlu0 %v959_v54 }
 0x5a1   :  { %981 = vrot.lane.b32.xlu1 %v5957_v29, %s5459_s5 }
 0x5a5   :  { %1135 = vrot.lane.b32.xlu1 %v5957_v29, %s5460_s27 }
 0x5a7   :  { %1057 = vrot.lane.b32.xlu0 %v5955_v27, %s5459_s5 }
 0x5a9   :  { %1213 = vrot.lane.b32.xlu1 %v5955_v27, %s5460_s27 }
 0x5ad   :  { %1211 = vrot.lane.b32.xlu1 %v5959_v30, %s5460_s27 }
 0x61d   :  { %v964_v55 = vpop.xlane.xlu1 %963 }
 0x61e   :  { %v966_v56 = vsub.f32 %v958_v51, %v964_v55  ;;  %v961_v57 = vpop.xlane.xlu0 %960 }
 0x61f   :  { %v965_v58 = vsub.f32 %v957_v52, %v961_v57 }
 0x620   :  { %v969_v59 = vmul.f32 1.442695, %v966_v56 }
 0x621   :  { %v967_v60 = vmul.f32 1.442695, %v965_v58  ;;  %v982_v61 = vpop.permute.xlu1 %981 }
 0x622   :  { %4936 = vpow2.f32 %v969_v59  ;;  %4561 = vmatpush3.msra.mxu0 %v982_v61  ;;  %v1058_v62 = vpop.permute.xlu0 %1057 }
 0x623   :  { %4566 = vmatpush3.msra.mxu1 %v1058_v62  ;;  %4570 = vmatprep.subr.mxu0 %v5456_v9  ;;  %4938 = vpow2.f32 %v967_v60 }
 0x624   :  { %4575 = vmatprep.subr.mxu1 %v5456_v9 }
 0x625   :  { %v1136_v11 = vpop.permute.xlu1 %1135 }
 0x629   :  { %v1214_v13 = vpop.permute.xlu1 %1213 }
 0x62c   :  { %v4937_v63 = vpop.eup %4936 }
 0x62d   :  { %v974_v0 = vsel %vm792_vm2, %v4937_v63, 0.0  ;;  %v4939_v1 = vpop.eup %4938  ;;  %v1212_v17 = vpop.permute.xlu1 %1211 }
 0x62e   :  { %975 = vadd.xlane.f32.xlu0 %v974_v0  ;;  %v971_v2 = vsel %vm792_vm2, %v4939_v1, 0.0 }
 0x632   :  { %972 = vadd.xlane.f32.xlu0 %v971_v2 }
 0x648   :  { %1133 = vrot.lane.b32.xlu0 %v5961_v31, %s5460_s27 }
 0x6bb   :  { %v976_v3 = vpop.xlane.xlu0 %975 }
 0x6bc   :  { %4940 = vrcp.f32 %v976_v3 }
 0x6bf   :  { %v973_v4 = vpop.xlane.xlu0 %972 }
 0x6c0   :  { %4942 = vrcp.f32 %v973_v4 }
 0x6c3   :  { %v1134_v18 = vpop.permute.xlu0 %1133 }
 0x6c6   :  { %v4941_v12 = vpop.eup %4940 }
 0x6c7   :  { %v980_v14 = vmul.f32 %v4941_v12, %v4937_v63 }
 0x6c9   :  { %4568 = vmatmul.mubr.msk.f32.vlgmr.msra.gmra.mrb[8].mxu1 %vm792_vm2, %v980_v14 }
 0x6ca   :  { %v4943_v15 = vpop.eup %4942  ;;  %4576 = vmatpush3.xpose.msk.msra.mxu1 %vm792_vm2, %v1214_v13  ;;  %4577 = vmatprep.mubr.msk.f32.mxu1 %vm5457_vm1, %v5456_v9 }
 0x6cb   :  { %v979_v16 = vmul.f32 %v4943_v15, %v4939_v1  ;;  %4585 = vmatprep.subr.mxu1 %v5456_v9 }
 0x6cd   :  { %4563 = vmatmul.mubr.msk.f32.vlgmr.msra.gmra.mrb[8].mxu0 %vm792_vm2, %v979_v16  ;;  %4578 = vmatmul.mubr.msk.f32.vlgmr.msra.gmra.mrb[10].mxu1 %vm792_vm2, %v1212_v17 }
 0x6ce   :  { %4571 = vmatpush3.xpose.msk.msra.mxu0 %vm792_vm2, %v1136_v11  ;;  %4572 = vmatprep.mubr.msk.f32.mxu0 %vm5457_vm1, %v5456_v9 }
 0x6cf   :  { %4580 = vmatprep.subr.mxu0 %v5456_v9  ;;  %4587 = vmatprep.mubr.msk.f32.mxu1 %vm5457_vm1, %v5456_v9 }
 0x6d1   :  { %4573 = vmatmul.mubr.msk.f32.vlgmr.msra.gmra.mrb[10].mxu0 %vm792_vm2, %v1134_v18 }
 0x6d2   :  { %4582 = vmatprep.mubr.msk.f32.mxu0 %vm5457_vm1, %v5456_v9 }
 0x79c   :  { %v6017_v19 = vpop.f32.mrb[8].mxu1 }
 0x79d   :  { %v4569_v20 = vpop.f32.mrb[9].mxu1 }
 0x7a0   :  { %v6019_v21 = vpop.f32.mrb[8].mxu0  ;;  %v1285_v22 = vpop.f32.mrb[10].mxu1 }
 0x7a1   :  { %v1290_v8 = vmul.f32 0.35355338, %v1285_v22  ;;  %v4564_v5 = vpop.f32.mrb[9].mxu0  ;;  %v4579_v7 = vpop.f32.mrb[11].mxu1 }
 0x7a3   :  { %v1292_v25 = vadd.f32 %v1290_v8, %v5977_v43 }
 0x7a4   :  { %v1207_v26 = vpop.f32.mrb[10].mxu0 }
 0x7a5   :  { %v1289_v28 = vmul.f32 0.35355338, %v1207_v26  ;;  %v4574_v32 = vpop.f32.mrb[11].mxu0  ;;  %v1296_v33 = vsel %vm792_vm2, %v1292_v25, -inf }
 0x7a6   :  { %1297 = vmax.xlane.f32.xlu1 %v1296_v33 }
 0x7a7   :  { %v1291_v34 = vadd.f32 %v1289_v28, %v5979_v45 }
 0x7a9   :  { %v1293_v35 = vsel %vm792_vm2, %v1291_v34, -inf }
 0x7aa   :  { %1294 = vmax.xlane.f32.xlu0 %v1293_v35 }
 0x7b7   :  { %1315 = vrot.lane.b32.xlu1 %v5957_v29, %s5461_s15 }
 0x7bb   :  { %1469 = vrot.lane.b32.xlu1 %v5957_v29, %s5462_s2 }
 0x7bf   :  { %1547 = vrot.lane.b32.xlu1 %v5955_v27, %s5462_s2 }
 0x7c0   :  { %1391 = vrot.lane.b32.xlu0 %v5955_v27, %s5461_s15 }
 0x7c3   :  { %1545 = vrot.lane.b32.xlu1 %v5959_v30, %s5462_s2 }
 0x833   :  { %v1298_v36 = vpop.xlane.xlu1 %1297 }
 0x834   :  { %v1300_v37 = vsub.f32 %v1292_v25, %v1298_v36 }
 0x836   :  { %v1303_v38 = vmul.f32 1.442695, %v1300_v37 }
 0x837   :  { %v1316_v39 = vpop.permute.xlu1 %1315  ;;  %v1295_v40 = vpop.xlane.xlu0 %1294 }
 0x838   :  { %4944 = vpow2.f32 %v1303_v38  ;;  %v1299_v41 = vsub.f32 %v1291_v34, %v1295_v40  ;;  %4581 = vmatpush3.msra.mxu0 %v1316_v39 }
 0x839   :  { %4590 = vmatprep.subr.mxu0 %v5456_v9 }
 0x83a   :  { %v1301_v42 = vmul.f32 1.442695, %v1299_v41 }
 0x83b   :  { %v1392_v44 = vpop.permute.xlu0 %1391  ;;  %v1470_v52 = vpop.permute.xlu1 %1469 }
 0x83c   :  { %4946 = vpow2.f32 %v1301_v42  ;;  %4586 = vmatpush3.msra.mxu1 %v1392_v44 }
 0x83d   :  { %4595 = vmatprep.subr.mxu1 %v5456_v9 }
 0x83f   :  { %v1548_v54 = vpop.permute.xlu1 %1547 }
 0x842   :  { %v4945_v46 = vpop.eup %4944 }
 0x843   :  { %v1308_v47 = vsel %vm792_vm2, %v4945_v46, 0.0  ;;  %v1546_v58 = vpop.permute.xlu1 %1545 }
 0x844   :  { %1309 = vadd.xlane.f32.xlu0 %v1308_v47 }
 0x846   :  { %v4947_v48 = vpop.eup %4946 }
 0x847   :  { %v1305_v49 = vsel %vm792_vm2, %v4947_v48, 0.0 }
 0x848   :  { %1306 = vadd.xlane.f32.xlu0 %v1305_v49 }
 0x85e   :  { %1467 = vrot.lane.b32.xlu0 %v5961_v31, %s5462_s2 }
 0x8d1   :  { %v1310_v50 = vpop.xlane.xlu0 %1309 }
 0x8d2   :  { %4948 = vrcp.f32 %v1310_v50 }
 0x8d5   :  { %v1307_v51 = vpop.xlane.xlu0 %1306 }
 0x8d6   :  { %4950 = vrcp.f32 %v1307_v51 }
 0x8d9   :  { %v1468_v59 = vpop.permute.xlu0 %1467 }
 0x8dc   :  { %v4949_v53 = vpop.eup %4948 }
 0x8dd   :  { %v1314_v55 = vmul.f32 %v4949_v53, %v4945_v46 }
 0x8df   :  { %4588 = vmatmul.mubr.msk.f32.vlgmr.msra.gmra.mrb[12].mxu1 %vm792_vm2, %v1314_v55 }
 0x8e0   :  { %v4951_v56 = vpop.eup %4950  ;;  %4596 = vmatpush3.xpose.msk.msra.mxu1 %vm792_vm2, %v1548_v54  ;;  %4597 = vmatprep.mubr.msk.f32.mxu1 %vm5457_vm1, %v5456_v9 }
 0x8e1   :  { %v1313_v57 = vmul.f32 %v4951_v56, %v4947_v48  ;;  %4605 = vmatprep.subr.mxu1 %v5456_v9 }
 0x8e3   :  { %4583 = vmatmul.mubr.msk.f32.vlgmr.msra.gmra.mrb[12].mxu0 %vm792_vm2, %v1313_v57  ;;  %4598 = vmatmul.mubr.msk.f32.vlgmr.msra.gmra.mrb[14].mxu1 %vm792_vm2, %v1546_v58 }
 0x8e4   :  { %4591 = vmatpush3.xpose.msk.msra.mxu0 %vm792_vm2, %v1470_v52  ;;  %4592 = vmatprep.mubr.msk.f32.mxu0 %vm5457_vm1, %v5456_v9 }
 0x8e5   :  { %4600 = vmatprep.subr.mxu0 %v5456_v9  ;;  %4607 = vmatprep.mubr.msk.f32.mxu1 %vm5457_vm1, %v5456_v9 }
 0x8e7   :  { %4593 = vmatmul.mubr.msk.f32.vlgmr.msra.gmra.mrb[14].mxu0 %vm792_vm2, %v1468_v59 }
 0x8e8   :  { %4602 = vmatprep.mubr.msk.f32.mxu0 %vm5457_vm1, %v5456_v9 }
 0x9b2   :  { %v6057_v60 = vpop.f32.mrb[12].mxu1 }
 0x9b3   :  { %v4589_v61 = vpop.f32.mrb[13].mxu1 }
 0x9b6   :  { %v6059_v62 = vpop.f32.mrb[12].mxu0  ;;  %v1619_v63 = vpop.f32.mrb[14].mxu1 }
 0x9b7   :  { %v1624_v0 = vmul.f32 0.35355338, %v1619_v63  ;;  %v4584_v1 = vpop.f32.mrb[13].mxu0  ;;  %v4599_v2 = vpop.f32.mrb[15].mxu1 }
 0x9b9   :  { %v1626_v3 = vadd.f32 %v1624_v0, %v5977_v43 }
 0x9ba   :  { %v1541_v4 = vpop.f32.mrb[14].mxu0 }
 0x9bb   :  { %v1623_v11 = vmul.f32 0.35355338, %v1541_v4  ;;  %v4594_v12 = vpop.f32.mrb[15].mxu0  ;;  %v1630_v13 = vsel %vm792_vm2, %v1626_v3, -inf  ;;  %v2254_v4 = vld [vmem:[#allocation21] sm:$0xff] }
 0x9bc   :  { %1631 = vmax.xlane.f32.xlu1 %v1630_v13 }
 0x9bd   :  { %v1625_v14 = vadd.f32 %v1623_v11, %v5979_v45  ;;  %v2255_v11 = vld [vmem:[#allocation21 + $0x8] sm:$0xff] }
 0x9be   :  { %v4833_v13 = vpack.c.bf16 %v2255_v11, %v2254_v4 }
 0x9bf   :  { %v1627_v15 = vsel %vm792_vm2, %v1625_v14, -inf }
 0x9c0   :  { %1628 = vmax.xlane.f32.xlu0 %v1627_v15  ;;  %v2256_v15 = vld [vmem:[#allocation21 + $0x10] sm:$0xff] }
 0x9cd   :  { %1649 = vrot.lane.b32.xlu1 %v5957_v29, %s5463_s8 }
 0x9d1   :  { %1803 = vrot.lane.b32.xlu1 %v5957_v29, %s5464_s0 }
 0x9d5   :  { %1881 = vrot.lane.b32.xlu1 %v5955_v27, %s5464_s0 }
 0x9d6   :  { %1725 = vrot.lane.b32.xlu0 %v5955_v27, %s5463_s8 }
 0x9d9   :  { %1879 = vrot.lane.b32.xlu1 %v5959_v30, %s5464_s0 }
 0xa49   :  { %v1632_v16 = vpop.xlane.xlu1 %1631 }
 0xa4a   :  { %v1634_v17 = vsub.f32 %v1626_v3, %v1632_v16  ;;  %v2257_v16 = vld [vmem:[#allocation21 + $0x18] sm:$0xff] }
 0xa4c   :  { %v1637_v18 = vmul.f32 1.442695, %v1634_v17 }
 0xa4d   :  { %v1650_v20 = vpop.permute.xlu1 %1649  ;;  %v1629_v22 = vpop.xlane.xlu0 %1628 }
 0xa4e   :  { %4952 = vpow2.f32 %v1637_v18  ;;  %v1633_v8 = vsub.f32 %v1625_v14, %v1629_v22  ;;  %4601 = vmatpush3.msra.mxu0 %v1650_v20  ;;  %v4837_v20 = vpack.c.bf16 %v2257_v16, %v2256_v15 }
 0xa4f   :  { %4610 = vmatprep.subr.mxu0 %v5456_v9 }
 0xa50   :  { %v1635_v5 = vmul.f32 1.442695, %v1633_v8  ;;  %v613_v8 = vld [vmem:[#allocation18] sm:$0xff] }
 0xa51   :  { %v1726_v7 = vpop.permute.xlu0 %1725  ;;  %v1804_v34 = vpop.permute.xlu1 %1803 }
 0xa52   :  { %4954 = vpow2.f32 %v1635_v5  ;;  %4606 = vmatpush3.msra.mxu1 %v1726_v7  ;;  %v614_v5 = vld [vmem:[#allocation18 + $0x8] sm:$0xff] }
 0xa53   :  { %4615 = vmatprep.subr.mxu1 %v5456_v9  ;;  %v4825_v7 = vpack.c.bf16 %v614_v5, %v613_v8 }
 0xa55   :  { %v1882_v36 = vpop.permute.xlu1 %1881 }
 0xa58   :  { %v4953_v25 = vpop.eup %4952 }
 0xa59   :  { %v1642_v26 = vsel %vm792_vm2, %v4953_v25, 0.0 }
 0xa5a   :  { %1643 = vadd.xlane.f32.xlu0 %v1642_v26 }
 0xa5c   :  { %v4955_v30 = vpop.eup %4954 }
 0xa5d   :  { %v1639_v28 = vsel %vm792_vm2, %v4955_v30, 0.0 }
 0xa5e   :  { %1640 = vadd.xlane.f32.xlu0 %v1639_v28 }
 0xa74   :  { %1801 = vrot.lane.b32.xlu0 %v5961_v31, %s5464_s0  ;;  %v1880_v31 = vpop.permute.xlu1 %1879 }
 0xae7   :  { %v1644_v32 = vpop.xlane.xlu0 %1643 }
 0xae8   :  { %4956 = vrcp.f32 %v1644_v32 }
 0xaeb   :  { %v1641_v33 = vpop.xlane.xlu0 %1640 }
 0xaec   :  { %4958 = vrcp.f32 %v1641_v33 }
 0xaef   :  { %v1802_v40 = vpop.permute.xlu0 %1801 }
 0xaf2   :  { %v4957_v35 = vpop.eup %4956 }
 0xaf3   :  { %v1648_v37 = vmul.f32 %v4957_v35, %v4953_v25  ;;  %v615_v25 = vld [vmem:[#allocation18 + $0x10] sm:$0xff] }
 0xaf5   :  { %4608 = vmatmul.mubr.msk.f32.vlgmr.msra.gmra.mrb[16].mxu1 %vm792_vm2, %v1648_v37 }
 0xaf6   :  { %v4959_v38 = vpop.eup %4958  ;;  %4616 = vmatpush3.xpose.msk.msra.mxu1 %vm792_vm2, %v1882_v36  ;;  %4617 = vmatprep.mubr.msk.f32.mxu1 %vm5457_vm1, %v5456_v9 }
 0xaf7   :  { %v1647_v39 = vmul.f32 %v4959_v38, %v4955_v30  ;;  %4625 = vmatprep.subr.mxu1 %v5456_v9  ;;  %v2259_v30 = vld [vmem:[%s6415_s17] sm:$0xff] }
 0xaf9   :  { %4603 = vmatmul.mubr.msk.f32.vlgmr.msra.gmra.mrb[16].mxu0 %vm792_vm2, %v1647_v39  ;;  %4618 = vmatmul.mubr.msk.f32.vlgmr.msra.gmra.mrb[18].mxu1 %vm792_vm2, %v1880_v31 }
 0xafa   :  { %4611 = vmatpush3.xpose.msk.msra.mxu0 %vm792_vm2, %v1804_v34  ;;  %4612 = vmatprep.mubr.msk.f32.mxu0 %vm5457_vm1, %v5456_v9 }
 0xafb   :  { %4620 = vmatprep.subr.mxu0 %v5456_v9  ;;  %4627 = vmatprep.mubr.msk.f32.mxu1 %vm5457_vm1, %v5456_v9 }
 0xafd   :  { %4613 = vmatmul.mubr.msk.f32.vlgmr.msra.gmra.mrb[18].mxu0 %vm792_vm2, %v1802_v40 }
 0xafe   :  { %4622 = vmatprep.mubr.msk.f32.mxu0 %vm5457_vm1, %v5456_v9 }
 0xbc8   :  { %v1797_v41 = vpop.f32.mrb[16].mxu1 }
 0xbc9   :  { %v4609_v42 = vpop.f32.mrb[17].mxu1 }
 0xbca   :  { %v2262_v42 = vld [vmem:[%s6415_s17 + $0x18] sm:$0xff] }
 0xbcc   :  { %v1721_v44 = vpop.f32.mrb[16].mxu0  ;;  %v1953_v46 = vpop.f32.mrb[18].mxu1 }
 0xbcd   :  { %v1958_v47 = vmul.f32 0.35355338, %v1953_v46  ;;  %v4604_v48 = vpop.f32.mrb[17].mxu0  ;;  %v4619_v49 = vpop.f32.mrb[19].mxu1 }
 0xbcf   :  { %v1960_v50 = vadd.f32 %v1958_v47, %v5977_v43 }
 0xbd0   :  { %v1875_v51 = vpop.f32.mrb[18].mxu0 }
 0xbd1   :  { %v1957_v52 = vmul.f32 0.35355338, %v1875_v51  ;;  %v4614_v53 = vpop.f32.mrb[19].mxu0  ;;  %v1964_v54 = vsel %vm792_vm2, %v1960_v50, -inf }
 0xbd2   :  { %1965 = vmax.xlane.f32.xlu1 %v1964_v54  ;;  %v4320_v54 = vld [vmem:[#allocation24] ss:$0 sm:$0xff] }
 0xbd3   :  { %v1959_v55 = vadd.f32 %v1957_v52, %v5979_v45 }
 0xbd5   :  { %v1961_v56 = vsel %vm792_vm2, %v1959_v55, -inf }
 0xbd6   :  { %1962 = vmax.xlane.f32.xlu0 %v1961_v56 }
 0xbe3   :  { %1983 = vrot.lane.b32.xlu1 %v5957_v29, %s5465_s20 }
 0xbe7   :  { %2137 = vrot.lane.b32.xlu1 %v6059_v62, %s6458_s28 }
 0xbeb   :  { %2139 = vrot.lane.b32.xlu1 %v6057_v60, %s6458_s28 }
 0xbef   :  { %2147 = vrot.lane.b32.xlu1 %v1797_v41, %s5466_s3  ;;  %v2261_v41 = vld [vmem:[%s6415_s17 + $0x10] sm:$0xff] }
 0xbf0   :  { %v4845_v52 = vpack.c.bf16 %v2262_v42, %v2261_v41 }
 0xc5f   :  { %v1966_v57 = vpop.xlane.xlu1 %1965 }
 0xc60   :  { %v1968_v58 = vsub.f32 %v1960_v50, %v1966_v57  ;;  %v4317_v57 = vld [vmem:[#allocation22] ss:$0 sm:$0xff] }
 0xc62   :  { %v1971_v59 = vmul.f32 1.442695, %v1968_v58 }
 0xc63   :  { %v1984_v61 = vpop.permute.xlu1 %1983  ;;  %v1963_v63 = vpop.xlane.xlu0 %1962 }
 0xc64   :  { %4960 = vpow2.f32 %v1971_v59  ;;  %v1967_v0 = vsub.f32 %v1959_v55, %v1963_v63  ;;  %4621 = vmatpush3.msra.mxu0 %v1984_v61 }
 0xc65   :  { %4826 = vmatprep.subr.bf16.mxu0 %v4825_v7 }
 0xc66   :  { %v1969_v1 = vmul.f32 1.442695, %v1967_v0 }
 0xc67   :  { %v2138_v38 = vpop.permute.xlu1 %2137 }
 0xc68   :  { %4962 = vpow2.f32 %v1969_v1 }
 0xc6b   :  { %v2140_v39 = vpop.permute.xlu1 %2139 }
 0xc6c   :  { %v2160_v47 = vsel %vm792_vm2, %v6017_v19, %v2140_v39 }
 0xc6e   :  { %v4961_v29 = vpop.eup %4960 }
 0xc6f   :  { %v1976_v2 = vsel %vm792_vm2, %v4961_v29, 0.0  ;;  %v2148_v31 = vpop.permute.xlu1 %2147 }
 0xc70   :  { %1977 = vadd.xlane.f32.xlu0 %v1976_v2  ;;  %v2163_v50 = vsel %vm2161_vm3, %v2160_v47, %v2148_v31 }
 0xc72   :  { %v4963_v62 = vpop.eup %4962 }
 0xc73   :  { %v1973_v60 = vsel %vm792_vm2, %v4963_v62, 0.0 }
 0xc74   :  { %1974 = vadd.xlane.f32.xlu0 %v1973_v60 }
 0xc8a   :  { %2059 = vrot.lane.b32.xlu0 %v5955_v27, %s5465_s20 }
 0xc8e   :  { %2145 = vrot.lane.b32.xlu0 %v1721_v44, %s5466_s3  ;;  %v2159_v44 = vsel %vm792_vm2, %v6019_v21, %v2138_v38 }
 0xcfd   :  { %v1978_v3 = vpop.xlane.xlu0 %1977 }
 0xcfe   :  { %4964 = vrcp.f32 %v1978_v3 }
 0xd01   :  { %v1975_v12 = vpop.xlane.xlu0 %1974 }
 0xd02   :  { %4966 = vrcp.f32 %v1975_v12 }
 0xd05   :  { %v2060_v14 = vpop.permute.xlu0 %2059 }
 0xd06   :  { %4626 = vmatpush3.msra.mxu1 %v2060_v14 }
 0xd07   :  { %4834 = vmatprep.subr.bf16.mxu1 %v4833_v13 }
 0xd08   :  { %v4965_v17 = vpop.eup %4964 }
 0xd09   :  { %v1982_v18 = vmul.f32 %v4965_v17, %v4961_v29  ;;  %v2146_v40 = vpop.permute.xlu0 %2145 }
 0xd0a   :  { %v2162_v48 = vsel %vm2161_vm3, %v2159_v44, %v2146_v40 }
 0xd0b   :  { %4628 = vmatmul.mubr.msk.f32.vlgmr.msra.gmra.mrb[20].mxu1 %vm792_vm2, %v1982_v18 }
 0xd0c   :  { %v4967_v27 = vpop.eup %4966  ;;  %4836 = vmatpush3.bf16.msra.mxu1 %v4833_v13  ;;  %4649 = vmatprep.mubr.msk.f32.mxu1 %vm347_vm0, %v5941_v23  ;;  %v616_v23 = vld [vmem:[#allocation18 + $0x18] sm:$0xff] }
 0xd0d   :  { %v1981_v22 = vmul.f32 %v4967_v27, %v4963_v62  ;;  %4838 = vmatprep.subr.bf16.mxu1 %v4837_v20  ;;  %v4829_v26 = vpack.c.bf16 %v616_v23, %v615_v25 }
 0xd0f   :  { %4623 = vmatmul.mubr.msk.f32.vlgmr.msra.gmra.mrb[20].mxu0 %vm792_vm2, %v1981_v22 }
 0xd10   :  { %4840 = vmatpush3.bf16.msra.mxu1 %v4837_v20  ;;  %4828 = vmatpush3.bf16.msra.mxu0 %v4825_v7 }
 0xd11   :  { %4663 = vmatprep.subr.mxu1 %v5456_v9  ;;  %4830 = vmatprep.subr.bf16.mxu0 %v4829_v26 }
 0xd13   :  { %4650 = vmatmul.mubr.msk.f32.vlgmr.msra.gmra.mrb[22].mxu1 %vm347_vm0, %v5943_v24  ;;  %v2260_v24 = vld [vmem:[%s6415_s17 + $0x8] sm:$0xff] }
 0xd14   :  { %4665 = vmatprep.mubr.msk.f32.mxu1 %vm5457_vm1, %v5456_v9  ;;  %4832 = vmatpush3.bf16.msra.mxu0 %v4829_v26  ;;  %v4841_v28 = vpack.c.bf16 %v2260_v24, %v2259_v30 }
 0xd16   :  { %4842 = vmatprep.subr.bf16.mxu0 %v4841_v28 }
 0xdde   :  { %v2131_v32 = vpop.f32.mrb[20].mxu1 }
 0xddf   :  { %2155 = vrot.lane.b32.xlu1 %v2131_v32, %s5467_s19  ;;  %v4629_v33 = vpop.f32.mrb[21].mxu1 }
 0xde2   :  { %v2055_v34 = vpop.f32.mrb[20].mxu0 }
 0xde3   :  { %2153 = vrot.lane.b32.xlu0 %v2055_v34, %s5467_s19  ;;  %v4624_v35 = vpop.f32.mrb[21].mxu0 }
 0xde6   :  { %v4651_v36 = vpop.f32.mrb[22].mxu1 }
 0xde7   :  { %v2341_v37 = vpop.f32.mrb[23].mxu1  ;;  %v6172_v59 = vadd.f32 %v4651_v36, %v4317_v57 }
 0xe51   :  { %v2156_v46 = vpop.permute.xlu1 %2155 }
 0xe52   :  { %v2166_v53 = vsel %vm2164_vm4, %v2163_v50, %v2156_v46 }
 0xe55   :  { %v2154_v49 = vpop.permute.xlu0 %2153 }
 0xe56   :  { %v2165_v51 = vsel %vm2164_vm4, %v2162_v48, %v2154_v49 }
 0xe57   :  { %4638 = vmatprep.mubr.msk.f32.mxu0 %vm347_vm0, %v2165_v51 }
 0xe58   :  { %4639 = vmatmul.mubr.msk.f32.vlgmr.msra.gmra.mrb[22].mxu0 %vm347_vm0, %v2166_v53 }
 0xe59   :  { %4844 = vmatpush3.bf16.msra.mxu0 %v4841_v28  ;;  %4660 = vmatprep.mubr.msk.f32.mxu0 %vm347_vm0, %v5929_v6  ;;  %v6161_v6 = vadd.f32 %v4317_v57, %v2341_v37 }
 0xe5a   :  { %4846 = vmatprep.subr.bf16.mxu0 %v4845_v52 }
 0xe5d   :  { %4848 = vmatpush3.bf16.msra.mxu0 %v4845_v52 }
 0xe5e   :  { %4673 = vmatprep.subr.mxu0 %v5456_v9 }
 0xe60   :  { %4661 = vmatmul.mubr.msk.f32.vlgmr.msra.gmra.mrb[24].mxu0 %vm347_vm0, %v5931_v10 }
 0xe61   :  { %4675 = vmatprep.mubr.msk.f32.mxu0 %vm5457_vm1, %v5456_v9 }
 0xf2b   :  { %v6153_v19 = vpop.f32.mrb[22].mxu0 }
 0xf2c   :  { %v6155_v21 = vpop.f32.mrb[23].mxu0 }
 0xf33   :  { %v4662_v55 = vpop.f32.mrb[24].mxu0 }
 0xf34   :  { %v2422_v56 = vpop.f32.mrb[25].mxu0  ;;  %v6164_v10 = vadd.f32 %v4662_v55, %v4320_v54 }
 0xf35   :  { %v6157_v58 = vadd.f32 %v4320_v54, %v2422_v56 }
 0xf37   :  { %4664 = vmatpush3.xpose.msk.msra.mxu1 %vm792_vm2, %v6157_v58 }
 0xf38   :  { %4668 = vmatprep.subr.mxu1 %v5456_v9 }
 0xf3a   :  { %4666 = vmatmul.mubr.msk.f32.vlgmr.msra.gmra.mrb[24].mxu1 %vm792_vm2, %v6161_v6 }
 0xf3b   :  { %4669 = vmatpush3.xpose.msk.msra.mxu1 %vm792_vm2, %v6164_v10  ;;  %4670 = vmatprep.mubr.msk.f32.mxu1 %vm5457_vm1, %v5456_v9 }
 0xf3c   :  { %4678 = vmatprep.subr.mxu1 %v5456_v9 }
 0xf3e   :  { %4671 = vmatmul.mubr.msk.f32.vlgmr.msra.gmra.mrb[26].mxu1 %vm792_vm2, %v6172_v59 }
 0xf3f   :  { %4680 = vmatprep.mubr.msk.f32.mxu1 %vm5457_vm1, %v5456_v9 }
0x100d   :  { %v2503_v61 = vpop.f32.mrb[24].mxu1 }
0x100e   :  { %v2583_v63 = vmul.f32 0.35355338, %v2503_v61  ;;  %v4667_v0 = vpop.f32.mrb[25].mxu1 }
0x1010   :  { %v2585_v1 = vadd.f32 %v2583_v63, %v5979_v45 }
0x1011   :  { %v2579_v29 = vpop.f32.mrb[26].mxu1 }
0x1012   :  { %v2584_v2 = vmul.f32 0.35355338, %v2579_v29  ;;  %v4672_v62 = vpop.f32.mrb[27].mxu1  ;;  %v2587_v60 = vsel %vm792_vm2, %v2585_v1, -inf }
0x1013   :  { %2588 = vmax.xlane.f32.xlu0 %v2587_v60 }
0x1014   :  { %v2586_v3 = vadd.f32 %v2584_v2, %v5977_v43 }
0x1016   :  { %v2590_v4 = vsel %vm792_vm2, %v2586_v3, -inf }
0x1017   :  { %2591 = vmax.xlane.f32.xlu1 %v2590_v4 }
0x1028   :  { %2609 = vrot.lane.b32.xlu1 %v6157_v58, %s5459_s5 }
0x1029   :  { %2685 = vrot.lane.b32.xlu0 %v6164_v10, %s5459_s5 }
0x102c   :  { %2763 = vrot.lane.b32.xlu1 %v6157_v58, %s5460_s27 }
0x1030   :  { %2841 = vrot.lane.b32.xlu1 %v6164_v10, %s5460_s27 }
0x1034   :  { %2839 = vrot.lane.b32.xlu1 %v6172_v59, %s5460_s27 }
0x10a0   :  { %v2589_v11 = vpop.xlane.xlu0 %2588 }
0x10a1   :  { %v2593_v12 = vsub.f32 %v2585_v1, %v2589_v11 }
0x10a3   :  { %v2595_v13 = vmul.f32 1.442695, %v2593_v12 }
0x10a4   :  { %v2686_v14 = vpop.permute.xlu0 %2685  ;;  %v2592_v15 = vpop.xlane.xlu1 %2591 }
0x10a5   :  { %4968 = vpow2.f32 %v2595_v13  ;;  %v2594_v16 = vsub.f32 %v2586_v3, %v2592_v15  ;;  %4679 = vmatpush3.msra.mxu1 %v2686_v14 }
0x10a6   :  { %4688 = vmatprep.subr.mxu1 %v5456_v9 }
0x10a7   :  { %v2597_v17 = vmul.f32 1.442695, %v2594_v16 }
0x10a8   :  { %v2610_v18 = vpop.permute.xlu1 %2609 }
0x10a9   :  { %4970 = vpow2.f32 %v2597_v17  ;;  %4674 = vmatpush3.msra.mxu0 %v2610_v18 }
0x10aa   :  { %4683 = vmatprep.subr.mxu0 %v5456_v9 }
0x10ac   :  { %v2764_v25 = vpop.permute.xlu1 %2763 }
0x10af   :  { %v4969_v20 = vpop.eup %4968 }
0x10b0   :  { %v2599_v27 = vsel %vm792_vm2, %v4969_v20, 0.0  ;;  %v2842_v24 = vpop.permute.xlu1 %2841 }
0x10b1   :  { %2600 = vadd.xlane.f32.xlu0 %v2599_v27 }
0x10b3   :  { %v4971_v22 = vpop.eup %4970 }
0x10b4   :  { %v2602_v8 = vsel %vm792_vm2, %v4971_v22, 0.0  ;;  %v2840_v33 = vpop.permute.xlu1 %2839 }
0x10b5   :  { %2603 = vadd.xlane.f32.xlu0 %v2602_v8 }
0x10cb   :  { %2761 = vrot.lane.b32.xlu0 %v6161_v6, %s5460_s27 }
0x113e   :  { %v2601_v5 = vpop.xlane.xlu0 %2600 }
0x113f   :  { %4972 = vrcp.f32 %v2601_v5 }
0x1142   :  { %v2604_v7 = vpop.xlane.xlu0 %2603 }
0x1143   :  { %4974 = vrcp.f32 %v2604_v7 }
0x1146   :  { %v2762_v32 = vpop.permute.xlu0 %2761 }
0x1149   :  { %v4973_v23 = vpop.eup %4972 }
0x114a   :  { %v2607_v26 = vmul.f32 %v4973_v23, %v4969_v20 }
0x114c   :  { %4676 = vmatmul.mubr.msk.f32.vlgmr.msra.gmra.mrb[26].mxu0 %vm792_vm2, %v2607_v26 }
0x114d   :  { %v4975_v30 = vpop.eup %4974  ;;  %4684 = vmatpush3.xpose.msk.msra.mxu0 %vm792_vm2, %v2764_v25  ;;  %4685 = vmatprep.mubr.msk.f32.mxu0 %vm5457_vm1, %v5456_v9 }
0x114e   :  { %v2608_v28 = vmul.f32 %v4975_v30, %v4971_v22  ;;  %4693 = vmatprep.subr.mxu0 %v5456_v9 }
0x1150   :  { %4681 = vmatmul.mubr.msk.f32.vlgmr.msra.gmra.mrb[28].mxu1 %vm792_vm2, %v2608_v28  ;;  %4686 = vmatmul.mubr.msk.f32.vlgmr.msra.gmra.mrb[28].mxu0 %vm792_vm2, %v2762_v32 }
0x1151   :  { %4689 = vmatpush3.xpose.msk.msra.mxu1 %vm792_vm2, %v2842_v24  ;;  %4690 = vmatprep.mubr.msk.f32.mxu1 %vm5457_vm1, %v5456_v9 }
0x1152   :  { %4698 = vmatprep.subr.mxu1 %v5456_v9  ;;  %4695 = vmatprep.mubr.msk.f32.mxu0 %vm5457_vm1, %v5456_v9 }
0x1154   :  { %4691 = vmatmul.mubr.msk.f32.vlgmr.msra.gmra.mrb[30].mxu1 %vm792_vm2, %v2840_v33 }
0x1155   :  { %4700 = vmatprep.mubr.msk.f32.mxu1 %vm5457_vm1, %v5456_v9 }
0x121f   :  { %v6215_v34 = vpop.f32.mrb[26].mxu0 }
0x1220   :  { %v4677_v35 = vpop.f32.mrb[27].mxu0 }
0x1223   :  { %v6217_v36 = vpop.f32.mrb[28].mxu1  ;;  %v2835_v37 = vpop.f32.mrb[28].mxu0 }
0x1224   :  { %v2917_v38 = vmul.f32 0.35355338, %v2835_v37  ;;  %v4682_v39 = vpop.f32.mrb[29].mxu1  ;;  %v4687_v31 = vpop.f32.mrb[29].mxu0 }
0x1226   :  { %v2919_v40 = vadd.f32 %v2917_v38, %v5979_v45 }
0x1227   :  { %v2913_v41 = vpop.f32.mrb[30].mxu1 }
0x1228   :  { %v2918_v42 = vmul.f32 0.35355338, %v2913_v41  ;;  %v4692_v44 = vpop.f32.mrb[31].mxu1  ;;  %v2921_v46 = vsel %vm792_vm2, %v2919_v40, -inf }
0x1229   :  { %2922 = vmax.xlane.f32.xlu0 %v2921_v46 }
0x122a   :  { %v2920_v47 = vadd.f32 %v2918_v42, %v5977_v43 }
0x122c   :  { %v2924_v48 = vsel %vm792_vm2, %v2920_v47, -inf }
0x122d   :  { %2925 = vmax.xlane.f32.xlu1 %v2924_v48 }
0x123e   :  { %2943 = vrot.lane.b32.xlu1 %v6157_v58, %s5461_s15 }
0x123f   :  { %3019 = vrot.lane.b32.xlu0 %v6164_v10, %s5461_s15 }
0x1242   :  { %3097 = vrot.lane.b32.xlu1 %v6157_v58, %s5462_s2 }
0x1246   :  { %3175 = vrot.lane.b32.xlu1 %v6164_v10, %s5462_s2 }
0x124a   :  { %3173 = vrot.lane.b32.xlu1 %v6172_v59, %s5462_s2 }
0x12b6   :  { %v2923_v49 = vpop.xlane.xlu0 %2922 }
0x12b7   :  { %v2927_v50 = vsub.f32 %v2919_v40, %v2923_v49 }
0x12b9   :  { %v2929_v51 = vmul.f32 1.442695, %v2927_v50 }
0x12ba   :  { %v3020_v52 = vpop.permute.xlu0 %3019  ;;  %v2926_v53 = vpop.xlane.xlu1 %2925 }
0x12bb   :  { %4976 = vpow2.f32 %v2929_v51  ;;  %v2928_v54 = vsub.f32 %v2920_v47, %v2926_v53  ;;  %4699 = vmatpush3.msra.mxu1 %v3020_v52 }
0x12bc   :  { %4708 = vmatprep.subr.mxu1 %v5456_v9 }
0x12bd   :  { %v2931_v55 = vmul.f32 1.442695, %v2928_v54 }
0x12be   :  { %v2944_v56 = vpop.permute.xlu1 %2943 }
0x12bf   :  { %4978 = vpow2.f32 %v2931_v55  ;;  %4694 = vmatpush3.msra.mxu0 %v2944_v56 }
0x12c0   :  { %4703 = vmatprep.subr.mxu0 %v5456_v9 }
0x12c2   :  { %v3098_v2 = vpop.permute.xlu1 %3097 }
0x12c5   :  { %v4977_v57 = vpop.eup %4976 }
0x12c6   :  { %v2933_v61 = vsel %vm792_vm2, %v4977_v57, 0.0  ;;  %v3176_v4 = vpop.permute.xlu1 %3175 }
0x12c7   :  { %2934 = vadd.xlane.f32.xlu0 %v2933_v61 }
0x12c9   :  { %v4979_v63 = vpop.eup %4978 }
0x12ca   :  { %v2936_v0 = vsel %vm792_vm2, %v4979_v63, 0.0  ;;  %v3174_v13 = vpop.permute.xlu1 %3173 }
0x12cb   :  { %2937 = vadd.xlane.f32.xlu0 %v2936_v0 }
0x12e1   :  { %3095 = vrot.lane.b32.xlu0 %v6161_v6, %s5462_s2 }
0x1354   :  { %v2935_v1 = vpop.xlane.xlu0 %2934 }
0x1355   :  { %4980 = vrcp.f32 %v2935_v1 }
0x1358   :  { %v2938_v29 = vpop.xlane.xlu0 %2937 }
0x1359   :  { %4982 = vrcp.f32 %v2938_v29 }
0x135c   :  { %v3096_v12 = vpop.permute.xlu0 %3095 }
0x135f   :  { %v4981_v62 = vpop.eup %4980 }
0x1360   :  { %v2941_v60 = vmul.f32 %v4981_v62, %v4977_v57 }
0x1362   :  { %4696 = vmatmul.mubr.msk.f32.vlgmr.msra.gmra.mrb[30].mxu0 %vm792_vm2, %v2941_v60 }
0x1363   :  { %v4983_v3 = vpop.eup %4982  ;;  %4704 = vmatpush3.xpose.msk.msra.mxu0 %vm792_vm2, %v3098_v2  ;;  %4705 = vmatprep.mubr.msk.f32.mxu0 %vm5457_vm1, %v5456_v9 }
0x1364   :  { %v2942_v11 = vmul.f32 %v4983_v3, %v4979_v63  ;;  %4713 = vmatprep.subr.mxu0 %v5456_v9 }
0x1366   :  { %4701 = vmatmul.mubr.msk.f32.vlgmr.msra.gmra.mrb[32].mxu1 %vm792_vm2, %v2942_v11  ;;  %4706 = vmatmul.mubr.msk.f32.vlgmr.msra.gmra.mrb[32].mxu0 %vm792_vm2, %v3096_v12 }
0x1367   :  { %4709 = vmatpush3.xpose.msk.msra.mxu1 %vm792_vm2, %v3176_v4  ;;  %4710 = vmatprep.mubr.msk.f32.mxu1 %vm5457_vm1, %v5456_v9 }
0x1368   :  { %4718 = vmatprep.subr.mxu1 %v5456_v9  ;;  %4715 = vmatprep.mubr.msk.f32.mxu0 %vm5457_vm1, %v5456_v9 }
0x136a   :  { %4711 = vmatmul.mubr.msk.f32.vlgmr.msra.gmra.mrb[34].mxu1 %vm792_vm2, %v3174_v13 }
0x136b   :  { %4720 = vmatprep.mubr.msk.f32.mxu1 %vm5457_vm1, %v5456_v9 }
0x1435   :  { %v6255_v14 = vpop.f32.mrb[30].mxu0 }
0x1436   :  { %v4697_v15 = vpop.f32.mrb[31].mxu0 }
0x1439   :  { %v6257_v16 = vpop.f32.mrb[32].mxu1  ;;  %v3169_v17 = vpop.f32.mrb[32].mxu0 }
0x143a   :  { %v3251_v18 = vmul.f32 0.35355338, %v3169_v17  ;;  %v4702_v20 = vpop.f32.mrb[33].mxu1  ;;  %v4707_v27 = vpop.f32.mrb[33].mxu0  ;;  %v3880_v17 = vld [vmem:[#allocation28] sm:$0xff] }
0x143c   :  { %v3253_v22 = vadd.f32 %v3251_v18, %v5979_v45  ;;  %v3881_v18 = vld [vmem:[#allocation28 + $0x8] sm:$0xff] }
0x143d   :  { %v3247_v8 = vpop.f32.mrb[34].mxu1  ;;  %v4857_v27 = vpack.c.bf16 %v3881_v18, %v3880_v17 }
0x143e   :  { %v3252_v5 = vmul.f32 0.35355338, %v3247_v8  ;;  %v4712_v7 = vpop.f32.mrb[35].mxu1  ;;  %v3255_v25 = vsel %vm792_vm2, %v3253_v22, -inf }
0x143f   :  { %3256 = vmax.xlane.f32.xlu0 %v3255_v25  ;;  %v3882_v7 = vld [vmem:[#allocation28 + $0x10] sm:$0xff]  ;;  %v3883_v25 = vld [vmem:[#allocation28 + $0x18] sm:$0xff] }
0x1440   :  { %v3254_v23 = vadd.f32 %v3252_v5, %v5977_v43 }
0x1442   :  { %v3258_v26 = vsel %vm792_vm2, %v3254_v23, -inf }
0x1443   :  { %3259 = vmax.xlane.f32.xlu1 %v3258_v26 }
0x1454   :  { %3277 = vrot.lane.b32.xlu1 %v6157_v58, %s5463_s8 }
0x1455   :  { %3353 = vrot.lane.b32.xlu0 %v6164_v10, %s5463_s8 }
0x1458   :  { %3431 = vrot.lane.b32.xlu1 %v6157_v58, %s5464_s0 }
0x145c   :  { %3509 = vrot.lane.b32.xlu1 %v6164_v10, %s5464_s0 }
0x1460   :  { %3507 = vrot.lane.b32.xlu1 %v6172_v59, %s5464_s0 }
0x14cc   :  { %v3257_v30 = vpop.xlane.xlu0 %3256 }
0x14cd   :  { %v3261_v24 = vsub.f32 %v3253_v22, %v3257_v30  ;;  %v4861_v30 = vpack.c.bf16 %v3883_v25, %v3882_v7 }
0x14cf   :  { %v3263_v28 = vmul.f32 1.442695, %v3261_v24 }
0x14d0   :  { %v3354_v32 = vpop.permute.xlu0 %3353  ;;  %v3260_v33 = vpop.xlane.xlu1 %3259 }
0x14d1   :  { %4984 = vpow2.f32 %v3263_v28  ;;  %v3262_v35 = vsub.f32 %v3254_v23, %v3260_v33  ;;  %4719 = vmatpush3.msra.mxu1 %v3354_v32  ;;  %v4314_v23 = vld [vmem:[#allocation19] ss:$0 sm:$0xff]  ;;  %v2264_v32 = vld [vmem:[#allocation25] sm:$0xff]  ;;  %v2265_v33 = vld [vmem:[#allocation25 + $0x8] sm:$0xff] }
0x14d2   :  { %4728 = vmatprep.subr.mxu1 %v5456_v9  ;;  %v6313_v24 = vadd.f32 %v4314_v23, %v6155_v21  ;;  %v6319_v28 = vadd.f32 %v6153_v19, %v4314_v23  ;;  %v2266_v21 = vld [vmem:[#allocation25 + $0x10] sm:$0xff]  ;;  %v3886_v19 = vld [vmem:[%s6421_s23 + $0x8] sm:$0xff] }
0x14d3   :  { %v3265_v37 = vmul.f32 1.442695, %v3262_v35  ;;  %v4849_v35 = vpack.c.bf16 %v2265_v33, %v2264_v32 }
0x14d4   :  { %v3278_v38 = vpop.permute.xlu1 %3277 }
0x14d5   :  { %4986 = vpow2.f32 %v3265_v37  ;;  %4714 = vmatpush3.msra.mxu0 %v3278_v38  ;;  %v2267_v37 = vld [vmem:[#allocation25 + $0x18] sm:$0xff] }
0x14d6   :  { %4723 = vmatprep.subr.mxu0 %v5456_v9  ;;  %v4853_v38 = vpack.c.bf16 %v2267_v37, %v2266_v21 }
0x14d8   :  { %v3432_v44 = vpop.permute.xlu1 %3431 }
0x14db   :  { %v4985_v39 = vpop.eup %4984 }
0x14dc   :  { %v3267_v31 = vsel %vm792_vm2, %v4985_v39, 0.0  ;;  %v3510_v49 = vpop.permute.xlu1 %3509 }
0x14dd   :  { %3268 = vadd.xlane.f32.xlu0 %v3267_v31 }
0x14df   :  { %v4987_v59 = vpop.eup %4986 }
0x14e0   :  { %v3270_v40 = vsel %vm792_vm2, %v4987_v59, 0.0  ;;  %v3508_v51 = vpop.permute.xlu1 %3507 }
0x14e1   :  { %3271 = vadd.xlane.f32.xlu0 %v3270_v40 }
0x14f7   :  { %3429 = vrot.lane.b32.xlu0 %v6161_v6, %s5464_s0 }
0x156a   :  { %v3269_v41 = vpop.xlane.xlu0 %3268 }
0x156b   :  { %4988 = vrcp.f32 %v3269_v41 }
0x156e   :  { %v3272_v42 = vpop.xlane.xlu0 %3271 }
0x156f   :  { %4990 = vrcp.f32 %v3272_v42 }
0x1572   :  { %v3430_v6 = vpop.permute.xlu0 %3429 }
0x1575   :  { %v4989_v46 = vpop.eup %4988 }
0x1576   :  { %v3275_v47 = vmul.f32 %v4989_v46, %v4985_v39  ;;  %v3885_v39 = vld [vmem:[%s6421_s23] sm:$0xff] }
0x1577   :  { %v4865_v31 = vpack.c.bf16 %v3886_v19, %v3885_v39 }
0x1578   :  { %4716 = vmatmul.mubr.msk.f32.vlgmr.msra.gmra.mrb[34].mxu0 %vm792_vm2, %v3275_v47 }
0x1579   :  { %v4991_v48 = vpop.eup %4990  ;;  %4724 = vmatpush3.xpose.msk.msra.mxu0 %vm792_vm2, %v3432_v44  ;;  %4725 = vmatprep.mubr.msk.f32.mxu0 %vm5457_vm1, %v5456_v9 }
0x157a   :  { %v3276_v50 = vmul.f32 %v4991_v48, %v4987_v59  ;;  %4733 = vmatprep.subr.mxu0 %v5456_v9  ;;  %v4350_v48 = vld [vmem:[#allocation30] ss:$0 sm:$0xff] }
0x157c   :  { %4721 = vmatmul.mubr.msk.f32.vlgmr.msra.gmra.mrb[36].mxu1 %vm792_vm2, %v3276_v50  ;;  %4726 = vmatmul.mubr.msk.f32.vlgmr.msra.gmra.mrb[36].mxu0 %vm792_vm2, %v3430_v6 }
0x157d   :  { %4729 = vmatpush3.xpose.msk.msra.mxu1 %vm792_vm2, %v3510_v49  ;;  %4730 = vmatprep.mubr.msk.f32.mxu1 %vm5457_vm1, %v5456_v9 }
0x157e   :  { %4738 = vmatprep.subr.mxu1 %v5456_v9  ;;  %4735 = vmatprep.mubr.msk.f32.mxu0 %vm5457_vm1, %v5456_v9 }
0x1580   :  { %4731 = vmatmul.mubr.msk.f32.vlgmr.msra.gmra.mrb[38].mxu1 %vm792_vm2, %v3508_v51 }
0x1581   :  { %4740 = vmatprep.mubr.msk.f32.mxu1 %vm5457_vm1, %v5456_v9 }
0x164b   :  { %v3349_v52 = vpop.f32.mrb[34].mxu0 }
0x164c   :  { %v4717_v53 = vpop.f32.mrb[35].mxu0 }
0x164f   :  { %v3425_v54 = vpop.f32.mrb[36].mxu1  ;;  %v3503_v55 = vpop.f32.mrb[36].mxu0 }
0x1650   :  { %v3585_v56 = vmul.f32 0.35355338, %v3503_v55  ;;  %v4722_v57 = vpop.f32.mrb[37].mxu1  ;;  %v4727_v61 = vpop.f32.mrb[37].mxu0 }
0x1651   :  { %v3887_v57 = vld [vmem:[%s6421_s23 + $0x10] sm:$0xff]  ;;  %v3888_v61 = vld [vmem:[%s6421_s23 + $0x18] sm:$0xff] }
0x1652   :  { %v3587_v63 = vadd.f32 %v3585_v56, %v5979_v45 }
0x1653   :  { %v3581_v0 = vpop.f32.mrb[38].mxu1 }
0x1654   :  { %v3586_v1 = vmul.f32 0.35355338, %v3581_v0  ;;  %v4732_v29 = vpop.f32.mrb[39].mxu1  ;;  %v3589_v2 = vsel %vm792_vm2, %v3587_v63, -inf }
0x1655   :  { %3590 = vmax.xlane.f32.xlu0 %v3589_v2 }
0x1656   :  { %v3588_v62 = vadd.f32 %v3586_v1, %v5977_v43  ;;  %v4869_v1 = vpack.c.bf16 %v3888_v61, %v3887_v57 }
0x1658   :  { %v3592_v60 = vsel %vm792_vm2, %v3588_v62, -inf }
0x1659   :  { %3593 = vmax.xlane.f32.xlu1 %v3592_v60  ;;  %v4347_v60 = vld [vmem:[#allocation27] ss:$0 sm:$0xff] }
0x166a   :  { %3611 = vrot.lane.b32.xlu1 %v6157_v58, %s5465_s20 }
0x166e   :  { %3765 = vrot.lane.b32.xlu1 %v6255_v14, %s6458_s28 }
0x1672   :  { %3767 = vrot.lane.b32.xlu1 %v6257_v16, %s6458_s28 }
0x1676   :  { %3775 = vrot.lane.b32.xlu1 %v3425_v54, %s5466_s3 }
0x16e2   :  { %v3591_v9 = vpop.xlane.xlu0 %3590 }
0x16e3   :  { %v3595_v45 = vsub.f32 %v3587_v63, %v3591_v9 }
0x16e5   :  { %v3597_v3 = vmul.f32 1.442695, %v3595_v45 }
0x16e6   :  { %v3594_v4 = vpop.xlane.xlu1 %3593 }
0x16e7   :  { %4992 = vpow2.f32 %v3597_v3  ;;  %v3596_v43 = vsub.f32 %v3588_v62, %v3594_v4 }
0x16e9   :  { %v3599_v11 = vmul.f32 1.442695, %v3596_v43 }
0x16ea   :  { %v3612_v12 = vpop.permute.xlu1 %3611 }
0x16eb   :  { %4994 = vpow2.f32 %v3599_v11  ;;  %4734 = vmatpush3.msra.mxu0 %v3612_v12 }
0x16ec   :  { %4850 = vmatprep.subr.bf16.mxu0 %v4849_v35 }
0x16ee   :  { %v3766_v47 = vpop.permute.xlu1 %3765 }
0x16ef   :  { %v3787_v51 = vsel %vm792_vm2, %v6215_v34, %v3766_v47 }
0x16f1   :  { %v4993_v13 = vpop.eup %4992 }
0x16f2   :  { %v3601_v58 = vsel %vm792_vm2, %v4993_v13, 0.0  ;;  %v3768_v50 = vpop.permute.xlu1 %3767 }
0x16f3   :  { %3602 = vadd.xlane.f32.xlu0 %v3601_v58  ;;  %v3788_v34 = vsel %vm792_vm2, %v6217_v36, %v3768_v50 }
0x16f5   :  { %v4995_v14 = vpop.eup %4994 }
0x16f6   :  { %v3604_v15 = vsel %vm792_vm2, %v4995_v14, 0.0  ;;  %v3776_v53 = vpop.permute.xlu1 %3775 }
0x16f7   :  { %3605 = vadd.xlane.f32.xlu0 %v3604_v15  ;;  %v3790_v63 = vsel %vm2161_vm3, %v3788_v34, %v3776_v53 }
0x170d   :  { %3687 = vrot.lane.b32.xlu0 %v6164_v10, %s5465_s20 }
0x1711   :  { %3773 = vrot.lane.b32.xlu0 %v3349_v52, %s5466_s3 }
0x1780   :  { %v3603_v16 = vpop.xlane.xlu0 %3602 }
0x1781   :  { %4996 = vrcp.f32 %v3603_v16  ;;  %v3997_v16 = vstv %s6422_s24 }
0x1784   :  { %v3606_v20 = vpop.xlane.xlu0 %3605 }
0x1785   :  { %4998 = vrcp.f32 %v3606_v20 }
0x1788   :  { %v3688_v22 = vpop.permute.xlu0 %3687 }
0x1789   :  { %4739 = vmatpush3.msra.mxu1 %v3688_v22 }
0x178a   :  { %4858 = vmatprep.subr.bf16.mxu1 %v4857_v27 }
0x178b   :  { %v4997_v8 = vpop.eup %4996 }
0x178c   :  { %v3609_v5 = vmul.f32 %v4997_v8, %v4993_v13  ;;  %v3774_v6 = vpop.permute.xlu0 %3773 }
0x178d   :  { %v3789_v54 = vsel %vm2161_vm3, %v3787_v51, %v3774_v6 }
0x178e   :  { %4736 = vmatmul.mubr.msk.f32.vlgmr.msra.gmra.mrb[38].mxu0 %vm792_vm2, %v3609_v5 }
0x178f   :  { %v4999_v10 = vpop.eup %4998  ;;  %4852 = vmatpush3.bf16.msra.mxu0 %v4849_v35 }
0x1790   :  { %v3610_v26 = vmul.f32 %v4999_v10, %v4995_v14  ;;  %4854 = vmatprep.subr.bf16.mxu0 %v4853_v38 }
0x1792   :  { %4741 = vmatmul.mubr.msk.f32.vlgmr.msra.gmra.mrb[40].mxu1 %vm792_vm2, %v3610_v26 }
0x1793   :  { %4860 = vmatpush3.bf16.msra.mxu1 %v4857_v27  ;;  %4762 = vmatprep.mubr.msk.f32.mxu1 %vm347_vm0, %v6313_v24 }
0x1794   :  { %4862 = vmatprep.subr.bf16.mxu1 %v4861_v30  ;;  %4856 = vmatpush3.bf16.msra.mxu0 %v4853_v38 }
0x1795   :  { %4866 = vmatprep.subr.bf16.mxu0 %v4865_v31 }
0x1797   :  { %4864 = vmatpush3.bf16.msra.mxu1 %v4861_v30 }
0x179a   :  { %4763 = vmatmul.mubr.msk.f32.vlgmr.msra.gmra.mrb[42].mxu1 %vm347_vm0, %v6319_v28 }
0x1861   :  { %v3683_v59 = vpop.f32.mrb[38].mxu0 }
0x1862   :  { %3781 = vrot.lane.b32.xlu0 %v3683_v59, %s5467_s19  ;;  %v4737_v40 = vpop.f32.mrb[39].mxu0  ;;  %v4151_v59 = vld [vmem:[%s6423_s25] sm:$0xff] }
0x1863   :  { %v4152_v40 = vld [vmem:[%s6423_s25 + $0x8] sm:$0xff] }
0x1865   :  { %v3759_v41 = vpop.f32.mrb[40].mxu1 }
0x1866   :  { %3783 = vrot.lane.b32.xlu1 %v3759_v41, %s5467_s19  ;;  %v4742_v42 = vpop.f32.mrb[41].mxu1  ;;  %v4873_v41 = vpack.c.bf16 %v4152_v40, %v4151_v59 }
0x1867   :  { %v4153_v42 = vld [vmem:[%s6423_s25 + $0x10] sm:$0xff] }
0x1868   :  { %4874 = vmatprep.subr.bf16.mxu1 %v4873_v41 }
0x1869   :  { %4876 = vmatpush3.bf16.msra.mxu1 %v4873_v41 }
0x186d   :  { %v4764_v44 = vpop.f32.mrb[42].mxu1 }
0x186e   :  { %v3974_v46 = vpop.f32.mrb[43].mxu1  ;;  %v3980_v52 = vadd.f32 %v4764_v44, %v4350_v48  ;;  %v4154_v44 = vld [vmem:[%s6423_s25 + $0x18] sm:$0xff] }
0x186f   :  { %v3975_v49 = vadd.f32 %v4350_v48, %v3974_v46  ;;  %v4877_v47 = vpack.c.bf16 %v4154_v44, %v4153_v42 }
0x1871   :  { %5000 = vtanh.f32 %v3975_v49  ;;  %4878 = vmatprep.subr.bf16.mxu1 %v4877_v47 }
0x1872   :  { %5002 = vtanh.f32 %v3980_v52  ;;  %4880 = vmatpush3.bf16.msra.mxu1 %v4877_v47 }
0x187b   :  { %v5001_v2 = vpop.eup %5000 }
0x187c   :  { %v5003_v62 = vpop.eup %5002 }
0x18d4   :  { %v3782_v55 = vpop.permute.xlu0 %3781 }
0x18d5   :  { %v3791_v56 = vsel %vm2164_vm4, %v3789_v54, %v3782_v55 }
0x18d6   :  { %4751 = vmatprep.mubr.msk.f32.mxu0 %vm347_vm0, %v3791_v56 }
0x18d8   :  { %v3784_v0 = vpop.permute.xlu1 %3783 }
0x18d9   :  { %v3792_v29 = vsel %vm2164_vm4, %v3790_v63, %v3784_v0 }
0x18da   :  { %4752 = vmatmul.mubr.msk.f32.vlgmr.msra.gmra.mrb[40].mxu0 %vm347_vm0, %v3792_v29  ;;  %v4244_v29 = vld [vmem:[#allocation12 + $0x8] sm:$0xff] }
0x18db   :  { %4868 = vmatpush3.bf16.msra.mxu0 %v4865_v31  ;;  %4776 = vmatprep.mubr.msk.f32.mxu0 %vm347_vm0, %v5001_v2 }
0x18dc   :  { %4870 = vmatprep.subr.bf16.mxu0 %v4869_v1 }
0x18df   :  { %4872 = vmatpush3.bf16.msra.mxu0 %v4869_v1 }
0x18e2   :  { %4777 = vmatmul.mubr.msk.f32.vlgmr.msra.gmra.mrb[42].mxu0 %vm347_vm0, %v5003_v62 }
0x19ad   :  { %v4753_v36 = vpop.f32.mrb[40].mxu0 }
0x19ae   :  { %v3871_v9 = vpop.f32.mrb[41].mxu0  ;;  %v6351_v3 = vadd.f32 %v4753_v36, %v4347_v60 }
0x19af   :  { %v6349_v45 = vadd.f32 %v4347_v60, %v3871_v9  ;;  %v4243_v60 = vld [vmem:[#allocation12] sm:$0xff] }
0x19b1   :  { %4765 = vmatprep.mubr.msk.f32.mxu1 %vm347_vm0, %v6349_v45 }
0x19b2   :  { %4766 = vmatmul.mubr.msk.f32.gmra.mrb[44].mxu1 %vm347_vm0, %v6351_v3 }
0x19b5   :  { %v4778_v4 = vpop.f32.mrb[42].mxu0 }
0x19b6   :  { %v4076_v43 = vpop.f32.mrb[43].mxu0  ;;  %v4082_v18 = vadd.f32 %v4778_v4, %v3997_v16 }
0x19b7   :  { %v4077_v22 = vadd.f32 %v4076_v43, %v3997_v16 }
0x1a85   :  { %v4767_v11 = vpop.f32.mrb[44].mxu1 }
0x1a86   :  { %v3990_v12 = vadd.f32 %v4767_v11, %v4350_v48  ;;  %v3984_v13 = vpop.f32.mrb[45].mxu1 }
0x1a87   :  { %v3985_v58 = vadd.f32 %v4350_v48, %v3984_v13 }
0x1a89   :  { %5004 = vtanh.f32 %v3985_v58 }
0x1a8a   :  { %5006 = vtanh.f32 %v3990_v12 }
0x1a93   :  { %v5005_v14 = vpop.eup %5004 }
0x1a94   :  { %v5007_v15 = vpop.eup %5006  ;;  %4779 = vmatprep.mubr.msk.f32.mxu0 %vm347_vm0, %v5005_v14 }
0x1a95   :  { %4780 = vmatmul.mubr.msk.f32.gmra.mrb[44].mxu0 %vm347_vm0, %v5007_v15 }
0x1b68   :  { %v4781_v17 = vpop.f32.mrb[44].mxu0 }
0x1b69   :  { %v4092_v20 = vadd.f32 %v4781_v17, %v3997_v16  ;;  %v4086_v27 = vpop.f32.mrb[45].mxu0 }
0x1b6a   :  { %v4087_v8 = vadd.f32 %v4086_v27, %v3997_v16 }
0x1b6b   :  { %v4096_v5 = vmax.f32 %v4082_v18, %v4092_v20 }
0x1b6c   :  { %v4095_v7 = vmax.f32 %v4077_v22, %v4087_v8 }
0x1b6d   :  { %v4098_v25 = vsub.f32 %v4082_v18, %v4096_v5  ;;  %v4104_v23 = vsub.f32 %v4092_v20, %v4096_v5 }
0x1b6e   :  { %v4097_v10 = vsub.f32 %v4077_v22, %v4095_v7  ;;  %v4103_v26 = vsub.f32 %v4087_v8, %v4095_v7 }
0x1b6f   :  { %v4101_v30 = vmul.f32 1.442695, %v4098_v25  ;;  %v4107_v32 = vmul.f32 1.442695, %v4104_v23 }
0x1b70   :  { %v4099_v33 = vmul.f32 1.442695, %v4097_v10  ;;  %v4105_v35 = vmul.f32 1.442695, %v4103_v26 }
0x1b71   :  { %5008 = vpow2.f32 %v4101_v30 }
0x1b72   :  { %5010 = vpow2.f32 %v4107_v32 }
0x1b73   :  { %5012 = vpow2.f32 %v4099_v33 }
0x1b74   :  { %5014 = vpow2.f32 %v4105_v35 }
0x1b7b   :  { %v5009_v21 = vpop.eup %5008 }
0x1b7c   :  { %v5011_v37 = vpop.eup %5010  ;;  %4120 = vperm.xlu0 %4915, %v5009_v21  }
0x1b7d   :  { %v5013_v38 = vpop.eup %5012  ;;  %v4110_v39 = vadd.f32 %v5011_v37, %v5009_v21 }
0x1b7e   :  { %v5015_v19 = vpop.eup %5014 }
0x1b7f   :  { %5016 = vrcp.f32 %v4110_v39  ;;  %v4109_v31 = vadd.f32 %v5015_v19, %v5013_v38  ;;  %4127 = vperm.xlu1 %4914, %v5015_v19  }
0x1b80   :  { %4115 = vperm.xlu0 %4915, %v5013_v38  }
0x1b81   :  { %5018 = vrcp.f32 %v4109_v31 }
0x1b83   :  { %4132 = vperm.xlu1 %4914, %v5011_v37  }
0x1b89   :  { %v5017_v46 = vpop.eup %5016 }
0x1b8a   :  { %4146 = vperm.xlu1 %4914, %v5017_v46  }
0x1b8b   :  { %v5019_v48 = vpop.eup %5018 }
0x1b8c   :  { %4141 = vperm.xlu0 %4915, %v5019_v48  }
0x1bfb   :  { %v4121_v49 = vpop.permute.xlu0 %4120 }
0x1bfc   :  { %v4124_v55 = vmul.f32 %v4121_v49, %v6319_v28 }
0x1bfe   :  { %v4128_v50 = vpop.permute.xlu1 %4127 }
0x1bff   :  { %v4116_v6 = vpop.permute.xlu0 %4115  ;;  %v4135_v54 = vmul.f32 %v4128_v50, %v6349_v45 }
0x1c00   :  { %v4123_v52 = vmul.f32 %v4116_v6, %v6313_v24  ;;  %v4359_v24 = vld [vmem:[%s6424_s26] ss:$0 sm:$0xff] }
0x1c02   :  { %v4133_v51 = vpop.permute.xlu1 %4132  ;;  %v4137_v57 = vadd.f32 %v4135_v54, %v4123_v52 }
0x1c03   :  { %v4136_v53 = vmul.f32 %v4133_v51, %v6351_v3 }
0x1c05   :  { %v4138_v61 = vadd.f32 %v4136_v53, %v4124_v55 }
0x1c09   :  { %v4147_v56 = vpop.permute.xlu1 %4146 }
0x1c0a   :  { %v4150_v0 = vmul.f32 %v4147_v56, %v4138_v61 }
0x1c0b   :  { %v4142_v34 = vpop.permute.xlu0 %4141 }
0x1c0c   :  { %v4149_v63 = vmul.f32 %v4142_v34, %v4137_v57 }
0x1c0e   :  { %4790 = vmatprep.mubr.msk.f32.mxu1 %vm347_vm0, %v4149_v63 }
0x1c0f   :  { %4791 = vmatmul.mubr.msk.f32.vlgmr.msra.gmra.mrb[46].mxu1 %vm347_vm0, %v4150_v0 }
0x1ce2   :  { %v4792_v1 = vpop.f32.mrb[46].mxu1 }
0x1ce3   :  { %v4240_v2 = vadd.f32 %v4792_v1, %v4359_v24  ;;  %v4234_v62 = vpop.f32.mrb[47].mxu1 }
0x1ce4   :  { %v4235_v28 = vadd.f32 %v4359_v24, %v4234_v62 }
0x1ce5   :  { %v4246_v36 = vadd.f32 %v4244_v29, %v4240_v2 }
0x1ce6   :  { %v4245_v9 = vadd.f32 %v4243_v60, %v4235_v28 }
0x1ce7   :  { %4248 = vst [vmem:[#allocation31 + $0x8] sm:$0xff] %v4246_v36 }
0x1ce8   :  { %4247 = vst [vmem:[#allocation31] sm:$0xff] %v4245_v9 }
0x1ce9   :  { %5405 = shalt.err (!%p5402_p0)
}
0x1cea   :  { %s6469_s13 = sld [smem:[#allocation54_spill]] }
0x1cf0   :  { %s5406_s1 = scalar_lea.hbm %s6469_s13, 256 }
0x1cf1   :  { %p5407_p1 = scmp.ne.s32.totalorder %s6469_s13, %s5406_s1  ;;  %p5410_p2 = scmp.lt.u32.totalorder %s5406_s1, %s6469_s13 }
0x1cf3   :  { %p5412_p3 = pnand %p5410_p2, %p5407_p1 }
0x1cf5   :  { %5415 = shalt.err (!%p5412_p3)
}
0x1cf6   :  { %4260 = dma.vmem_to_hbm [thread:$0]  %s4255_s6, 256, %s6469_s13, [#allocation6], %s6459_s7, %s6459_s7, %s6458_s28  }
0x1cf7   :  { %5434 = dma.done.wait [#allocation6], 256  }
0x1cf8   :  { %5435 = vsyncadd [#allocation6], 4294967040 }
0x1cf9   :  { %4264 = vsyncpa [#allocation5], 1 }
0x1cfa   :  { %4265 = vsyncpa [#allocation8], 1 }
0x1cfb   :  { %4266 = vsyncpa [#allocation11], 1 }
0x1cfc   :  { %4267 = vsyncpa [#allocation14], 1 }
0x1cfd   :  { %4268 = vsyncpa [#allocation17], 1 }
0x1cfe   :  { %4269 = vsyncpa [#allocation20], 1 }
0x1cff   :  { %4270 = vsyncpa [#allocation23], 1 }
0x1d00   :  { %4271 = vsyncpa [#allocation26], 1 }
0x1d01   :  { %4272 = vsyncpa [#allocation29], 1 }
0x1d02   :  { %4273 = vsyncpa [#allocation6], 1 }

</bundles_post_ra>
